<compile_context>
chip_gen: v6e
topology: v6e:2x2x1
jax: 0.10.0
libtpu: 0.0.40
codegen_flags: <defaults>
</compile_context>

<pallas_src>
import functools
import math

import jax
import jax.numpy as jnp
import numpy as np
from jax.experimental import pallas as pl
from jax.experimental.pallas import tpu as pltpu

EPS = 1e-5
LANE = 128
_VMEM_LIMIT = 32 * 1024 * 1024   # explicit scoped-VMEM request (safe on v5e/v6e/v7x)
_VMEM_BUDGET = 12 * 1024 * 1024  # per-tile working-set target (incl. intermediates)


def _round_up(x, m):
    return (x + m - 1) // m * m


def _tile_vmem_bytes(rt, kp, coutp):
    """Conservative per-tile VMEM estimate: activation tile, weights, in-kernel
    intermediates and double buffering, plus 50% headroom."""
    scw = 2 * coutp
    b = 2 * rt * kp * 2                          # x im2col tile (bf16), 2 buffers
    b += 2 * (kp * scw + 3 * coutp * coutp) * 2  # conv1(+sc) and conv2 weights (bf16)
    b += rt * scw * 4                            # y = conv1 | shortcut (f32)
    b += 2 * rt * coutp * 4                      # h, h2 (f32)
    b += 3 * rt * coutp * 2                      # bf16 conv2 taps
    b += 2 * rt * coutp * 2                      # output tile (bf16), 2 buffers
    return int(1.5 * b)


def _make_kernel(phase, RT, Lout, R, Coutp):
    """phase 0: conv1+shortcut stats; phase 1: conv2 stats; phase 2: output."""

    def _valid_mask():  # mask rows belonging to zero-padded samples
        rows = jax.lax.broadcasted_iota(jnp.int32, (RT, 1), 0)
        return ((rows + pl.program_id(0) * RT) < R).astype(jnp.float32)

    def _tap_masks():   # per-position validity of the left / right conv taps
        pos = jax.lax.broadcasted_iota(jnp.int32, (RT, 1), 0) % Lout
        return pos != 0, pos != (Lout - 1)

    def _conv1(xp_ref, w1_ref):
        # Wrapper-side packed im2col: one MXU matmul; output lanes
        # [0:Coutp] = conv1, [Coutp:2*Coutp] = shortcut (projection or identity).
        return jnp.dot(xp_ref[...], w1_ref[...],
                       preferred_element_type=jnp.float32)

    def _conv2(h, w2_ref, keep_l, keep_r):
        # Tiles contain whole samples, so the positional masks are also exact
        # at tile edges.  Three accumulating matmuls (no 3x-wide concat slab).
        l2 = jnp.where(keep_l, pltpu.roll(h, 1, axis=0), 0.0).astype(jnp.bfloat16)
        r2 = jnp.where(keep_r, pltpu.roll(h, RT - 1, axis=0), 0.0).astype(jnp.bfloat16)
        cb = h.astype(jnp.bfloat16)
        h2 = jnp.dot(l2, w2_ref[0], preferred_element_type=jnp.float32)
        h2 += jnp.dot(cb, w2_ref[1], preferred_element_type=jnp.float32)
        h2 += jnp.dot(r2, w2_ref[2], preferred_element_type=jnp.float32)
        return h2

    def _accum_stats(acc_ref, y, valid):
        w = y.shape[-1]

        @pl.when(pl.program_id(0) == 0)
        def _():
            acc_ref[...] = jnp.zeros_like(acc_ref)

        acc_ref[:, :w] += jnp.sum(y * valid, axis=0, keepdims=True)
        acc_ref[:, w:] += jnp.sum(y * y * valid, axis=0, keepdims=True)

    if phase == 0:
        def kernel(xp_ref, w1_ref, stats_ref):
            y = _conv1(xp_ref, w1_ref)
            _accum_stats(stats_ref, y, _valid_mask())
        return kernel

    if phase == 1:
        def kernel(xp_ref, w1_ref, s1_ref, t1_ref, w2_ref, stats_ref):
            keep_l, keep_r = _tap_masks()
            y = _conv1(xp_ref, w1_ref)
            h = jnp.maximum(y[:, :Coutp] * s1_ref[...] + t1_ref[...], 0.0)
            h2 = _conv2(h, w2_ref, keep_l, keep_r)
            _accum_stats(stats_ref, h2, _valid_mask())
        return kernel

    def kernel(xp_ref, w1_ref, s1_ref, t1_ref, w2_ref,
               s2_ref, t2_ref, ssc_ref, tsc_ref, out_ref):
        keep_l, keep_r = _tap_masks()
        y = _conv1(xp_ref, w1_ref)
        h = jnp.maximum(y[:, :Coutp] * s1_ref[...] + t1_ref[...], 0.0)
        h2 = _conv2(h, w2_ref, keep_l, keep_r)
        sc = y[:, Coutp:] * ssc_ref[...] + tsc_ref[...]   # identity: scale=1, shift=0
        out_ref[...] = jnp.maximum(h2 * s2_ref[...] + t2_ref[...] + sc,
                                   0.0).astype(out_ref.dtype)
    return kernel


@functools.partial(jax.jit, static_argnames=("stride", "samples_per_tile"))
def basic_block_pallas(x, params, *, stride, samples_per_tile=None):
    """x: (N, Cin, L) float32, PyTorch NCL layout.  Returns (N, Cout, Lout) f32."""
    assert stride in (1, 2), "ResNet BasicBlock uses stride 1 or 2"
    N, Cin, L = x.shape
    Cout = params["w1"].shape[0]
    Lout = (L + 2 - 3) // stride + 1
    R = N * Lout                                  # valid (unpadded) output rows
    Coutp = _round_up(Cout, LANE)
    Kp = _round_up(3 * Cin, LANE)
    SCW = 2 * Coutp                               # conv1 lanes | shortcut lanes
    has_proj = "wsc" in params

    # ---- row tiling: whole samples per tile, tile rows a multiple of 8 ----
    base = 8 // math.gcd(Lout, 8)
    if samples_per_tile is None:
        samples_per_tile = max(1, 512 // Lout)
    S = min(_round_up(samples_per_tile, base), _round_up(N, base))
    S = max(S, base)
    while S > base and _tile_vmem_bytes(S * Lout, Kp, Coutp) > _VMEM_BUDGET:
        S -= base
    RT = S * Lout
    assert _tile_vmem_bytes(RT, Kp, Coutp) <= _VMEM_LIMIT, "tile too large for VMEM"
    Npad = _round_up(N, S)
    num_tiles = Npad // S

    # ---- activations: wrapper-side packed im2col, bf16, channels-last ----
    xt = jnp.transpose(x, (0, 2, 1)).astype(jnp.float32)           # (N, L, Cin)
    xpd = jnp.pad(xt, ((0, Npad - N), (1, 1), (0, 0)))             # (Npad, L+2, Cin)
    taps = [xpd[:, k:k + stride * Lout:stride, :][:, :Lout, :] for k in range(3)]
    x_im = jnp.concatenate(taps, axis=-1)                          # (Npad, Lout, 3*Cin)
    x_im = jnp.pad(x_im, ((0, 0), (0, 0), (0, Kp - 3 * Cin)))
    x_im = x_im.reshape(Npad * Lout, Kp).astype(jnp.bfloat16)

    # ---- conv1 weight (tap-packed), fused with the shortcut as extra lanes ----
    w1 = jnp.transpose(params["w1"], (2, 1, 0)).astype(jnp.float32)
    w1 = jnp.pad(w1.reshape(3 * Cin, Cout), ((0, Kp - 3 * Cin), (0, Coutp - Cout)))
    if has_proj:
        sc_w = params["wsc"][:, :, 0].T.astype(jnp.float32)        # 1x1 conv weights
    else:
        assert Cin == Cout, "identity shortcut requires in_planes == planes"
        sc_w = jnp.eye(Cin, dtype=jnp.float32)                     # pick centre tap
    wsc = jnp.zeros((Kp, Coutp), jnp.float32).at[Cin:2 * Cin, :Cout].set(sc_w)
    w1f = jnp.concatenate([w1, wsc], axis=-1).astype(jnp.bfloat16)  # (Kp, 2*Coutp)

    # ---- conv2 weight: one (Coutp, Coutp) matrix per tap ----
    w2 = jnp.transpose(params["w2"], (2, 1, 0)).astype(jnp.float32)  # (3, Cin2, Cout)
    w2 = jnp.pad(w2, ((0, 0), (0, Coutp - Cout), (0, Coutp - Cout)))
    w2 = w2.astype(jnp.bfloat16)

    inv_n = 1.0 / float(R)

    def _pad_vec(v):
        v = v.reshape(1, -1).astype(jnp.float32)
        return jnp.pad(v, ((0, 0), (0, Coutp - v.shape[1])))

    def _fold(s, sq, gamma, beta):
        # training-mode (biased) batch statistics folded into one scale/shift
        mean = s * inv_n
        var = jnp.maximum(sq * inv_n - mean * mean, 0.0)
        scale = gamma * jax.lax.rsqrt(var + EPS)
        return scale, beta - mean * scale

    x_spec = pl.BlockSpec((RT, Kp), lambda t: (t, 0))

    def _const(a):                 # tile-invariant: DMA'd once, stays VMEM-resident
        return pl.BlockSpec(a.shape, lambda t, _n=a.ndim: (0,) * _n)

    acc_params = pltpu.CompilerParams(dimension_semantics=("arbitrary",),
                                      vmem_limit_bytes=_VMEM_LIMIT)
    par_params = pltpu.CompilerParams(dimension_semantics=("parallel",),
                                      vmem_limit_bytes=_VMEM_LIMIT)

    # ---- pass A: conv1 (+ projection shortcut) batch statistics ----
    stats1 = pl.pallas_call(
        _make_kernel(0, RT, Lout, R, Coutp),
        out_shape=jax.ShapeDtypeStruct((1, 2 * SCW), jnp.float32),
        grid=(num_tiles,),
        in_specs=[x_spec, _const(w1f)],
        out_specs=pl.BlockSpec((1, 2 * SCW), lambda t: (0, 0)),
        compiler_params=acc_params,
    )(x_im, w1f)

    s1, t1 = _fold(stats1[:, 0:Coutp], stats1[:, SCW:SCW + Coutp],
                   _pad_vec(params["g1"]), _pad_vec(params["b1"]))
    if has_proj:
        ssc, tsc = _fold(stats1[:, Coutp:SCW], stats1[:, SCW + Coutp:2 * SCW],
                         _pad_vec(params["gsc"]), _pad_vec(params["bsc"]))
    else:
        ssc = jnp.ones((1, Coutp), jnp.float32)
        tsc = jnp.zeros((1, Coutp), jnp.float32)

    # ---- pass B: conv2 batch statistics (conv1 recomputed per tile) ----
    stats2 = pl.pallas_call(
        _make_kernel(1, RT, Lout, R, Coutp),
        out_shape=jax.ShapeDtypeStruct((1, 2 * Coutp), jnp.float32),
        grid=(num_tiles,),
        in_specs=[x_spec, _const(w1f), _const(s1), _const(t1), _const(w2)],
        out_specs=pl.BlockSpec((1, 2 * Coutp), lambda t: (0, 0)),
        compiler_params=acc_params,
    )(x_im, w1f, s1, t1, w2)

    s2, t2 = _fold(stats2[:, 0:Coutp], stats2[:, Coutp:2 * Coutp],
                   _pad_vec(params["g2"]), _pad_vec(params["b2"]))

    # ---- pass C: BN1+ReLU, conv2, BN2, shortcut, residual, ReLU; bf16 store ----
    out2d = pl.pallas_call(
        _make_kernel(2, RT, Lout, R, Coutp),
        out_shape=jax.ShapeDtypeStruct((Npad * Lout, Coutp), jnp.bfloat16),
        grid=(num_tiles,),
        in_specs=[x_spec, _const(w1f), _const(s1), _const(t1), _const(w2),
                  _const(s2), _const(t2), _const(ssc), _const(tsc)],
        out_specs=pl.BlockSpec((RT, Coutp), lambda t: (t, 0)),
        compiler_params=par_params,
    )(x_im, w1f, s1, t1, w2, s2, t2, ssc, tsc)

    # TODO(synk): when chaining BasicBlocks, keep the (rows, Coutp) channels-last
    #             layout between blocks instead of per-block crop/transpose.
    out = out2d[:R, :Cout].astype(jnp.float32).reshape(N, Lout, Cout)
    return jnp.transpose(out, (0, 2, 1))


# ---------------- pure-JAX reference (for correctness check) ----------------
def _ref_conv1d(x, w, stride):
    return jax.lax.conv_general_dilated(
        x, w, window_strides=(stride,),
        padding=[(w.shape[-1] // 2, w.shape[-1] // 2)],
        dimension_numbers=("NCH", "OIH", "NCH"),
        precision=jax.lax.Precision.HIGHEST)


def _ref_bn(y, g, b):
    mean = y.mean(axis=(0, 2), keepdims=True)
    var = ((y - mean) ** 2).mean(axis=(0, 2), keepdims=True)
    return (y - mean) * jax.lax.rsqrt(var + EPS) * g.reshape(1, -1, 1) \
        + b.reshape(1, -1, 1)


def basic_block_ref(x, p, stride):
    out = jax.nn.relu(_ref_bn(_ref_conv1d(x, p["w1"], stride), p["g1"], p["b1"]))
    out = _ref_bn(_ref_conv1d(out, p["w2"], 1), p["g2"], p["b2"])
    if "wsc" in p:
        sc = _ref_bn(_ref_conv1d(x, p["wsc"], stride), p["gsc"], p["bsc"])
    else:
        sc = x
    return jax.nn.relu(out + sc)


def init_params(key, in_planes, planes, stride):
    ks = jax.random.split(key, 9)
    p = {
        "w1": 0.3 * jax.random.normal(ks[0], (planes, in_planes, 3), jnp.float32),
        "g1": 1.0 + 0.1 * jax.random.normal(ks[1], (planes,), jnp.float32),
        "b1": 0.1 * jax.random.normal(ks[2], (planes,), jnp.float32),
        "w2": 0.3 * jax.random.normal(ks[3], (planes, planes, 3), jnp.float32),
        "g2": 1.0 + 0.1 * jax.random.normal(ks[4], (planes,), jnp.float32),
        "b2": 0.1 * jax.random.normal(ks[5], (planes,), jnp.float32),
    }
    if stride != 1 or in_planes != planes:
        p["wsc"] = 0.3 * jax.random.normal(ks[6], (planes, in_planes, 1), jnp.float32)
        p["gsc"] = 1.0 + 0.1 * jax.random.normal(ks[7], (planes,), jnp.float32)
        p["bsc"] = 0.1 * jax.random.normal(ks[8], (planes,), jnp.float32)
    return p


if __name__ == "__main__":
    key = jax.random.PRNGKey(0)
    kx, kp1, kp2 = jax.random.split(key, 3)

    # input: (N, C_in, L) = (2, 4, 16)
    x = jax.random.normal(kx, (2, 4, 16), jnp.float32)

    # bf16 activations / MXU operands / bf16 output store -> relaxed tolerance
    TOL = dict(atol=4e-2, rtol=4e-2)

    # Case 1: identity shortcut (in_planes == planes, stride == 1)
    p1 = init_params(kp1, in_planes=4, planes=4, stride=1)
    ref1 = basic_block_ref(x, p1, 1)
    out1 = jax.block_until_ready(basic_block_pallas(x, p1, stride=1))
    np.testing.assert_allclose(np.asarray(out1), np.asarray(ref1), **TOL)
    # same case, forced multi-tile (exercises cross-tile stat accumulation)
    out1t = jax.block_until_ready(
        basic_block_pallas(x, p1, stride=1, samples_per_tile=1))
    np.testing.assert_allclose(np.asarray(out1t), np.asarray(ref1), **TOL)

    # Case 2: projection shortcut (planes=8, stride=2), multi-tile
    p2 = init_params(kp2, in_planes=4, planes=8, stride=2)
    ref2 = basic_block_ref(x, p2, 2)
    out2 = jax.block_until_ready(
        basic_block_pallas(x, p2, stride=2, samples_per_tile=1))
    assert out2.shape == (2, 8, 8)
    np.testing.assert_allclose(np.asarray(out2), np.asarray(ref2), **TOL)

    print("KERNEL_OK")
</pallas_src>

<mosaic_0001>
module attributes {stable_mosaic.version = 11 : i64} {
  func.func @kernel(%arg0: i32, %arg1: memref<32x128xbf16, #tpu.memory_space<vmem>>, %arg2: memref<128x256xbf16, #tpu.memory_space<vmem>>, %arg3: memref<1x128xf32, #tpu.memory_space<vmem>>, %arg4: memref<1x128xf32, #tpu.memory_space<vmem>>, %arg5: memref<3x128x128xbf16, #tpu.memory_space<vmem>>, %arg6: memref<1x128xf32, #tpu.memory_space<vmem>>, %arg7: memref<1x128xf32, #tpu.memory_space<vmem>>, %arg8: memref<1x128xf32, #tpu.memory_space<vmem>>, %arg9: memref<1x128xf32, #tpu.memory_space<vmem>>, %arg10: memref<32x128xbf16, #tpu.memory_space<vmem>>) attributes {dimension_semantics = [#tpu.dimension_semantics<parallel>], iteration_bounds = array<i64: 1>, scalar_prefetch = 0 : i64, scratch_operands = 0 : i64, tpu.core_type = #tpu.core_type<tc>, window_params = [{transform_indices = @transform_0, window_bounds = array<i64: 32, 128>}, {pipeline_mode = #tpu.pipeline_mode<synchronous>, transform_indices = @transform_1, window_bounds = array<i64: 128, 256>}, {pipeline_mode = #tpu.pipeline_mode<synchronous>, transform_indices = @transform_2, window_bounds = array<i64: 1, 128>}, {pipeline_mode = #tpu.pipeline_mode<synchronous>, transform_indices = @transform_3, window_bounds = array<i64: 1, 128>}, {pipeline_mode = #tpu.pipeline_mode<synchronous>, transform_indices = @transform_4, window_bounds = array<i64: 3, 128, 128>}, {pipeline_mode = #tpu.pipeline_mode<synchronous>, transform_indices = @transform_5, window_bounds = array<i64: 1, 128>}, {pipeline_mode = #tpu.pipeline_mode<synchronous>, transform_indices = @transform_6, window_bounds = array<i64: 1, 128>}, {pipeline_mode = #tpu.pipeline_mode<synchronous>, transform_indices = @transform_7, window_bounds = array<i64: 1, 128>}, {pipeline_mode = #tpu.pipeline_mode<synchronous>, transform_indices = @transform_8, window_bounds = array<i64: 1, 128>}, {transform_indices = @transform_9, window_bounds = array<i64: 32, 128>}]} {
    %0 = tpu.iota {dimensions = array<i32: 0>} : vector<32x1xi32>
    %c16_i32 = arith.constant 16 : i32
    %c0_i32 = arith.constant 0 : i32
    %1 = arith.cmpi eq, %c16_i32, %c0_i32 : i32
    %c1_i32 = arith.constant 1 : i32
    %2 = arith.select %1, %c1_i32, %c16_i32 : i32
    %3 = vector.broadcast %2 : i32 to vector<32x1xi32>
    %4 = arith.remsi %0, %3 : vector<32x1xi32>
    %c0_i32_0 = arith.constant 0 : i32
    %5 = vector.broadcast %c0_i32_0 : i32 to vector<32x1xi32>
    %6 = arith.cmpi ne, %4, %5 : vector<32x1xi32>
    %c0_i32_1 = arith.constant 0 : i32
    %7 = vector.broadcast %c0_i32_1 : i32 to vector<32x1xi32>
    %8 = arith.cmpi slt, %4, %7 : vector<32x1xi32>
    %c0_i32_2 = arith.constant 0 : i32
    %9 = arith.cmpi slt, %2, %c0_i32_2 : i32
    %10 = vector.broadcast %9 : i1 to vector<32x1xi1>
    %11 = vector.broadcast %10 : vector<32x1xi1> to vector<32x1xi1>
    %12 = arith.xori %8, %11 : vector<32x1xi1>
    %13 = arith.andi %12, %6 : vector<32x1xi1>
    %14 = vector.broadcast %2 : i32 to vector<32x1xi32>
    %15 = arith.addi %4, %14 : vector<32x1xi32>
    %16 = arith.select %13, %15, %4 : vector<32x1xi1>, vector<32x1xi32>
    %c0_i32_3 = arith.constant 0 : i32
    %17 = vector.broadcast %c0_i32_3 : i32 to vector<32x1xi32>
    %18 = arith.cmpi ne, %16, %17 : vector<32x1xi32>
    %c15_i32 = arith.constant 15 : i32
    %19 = vector.broadcast %c15_i32 : i32 to vector<32x1xi32>
    %20 = arith.cmpi ne, %16, %19 : vector<32x1xi32>
    %c0 = arith.constant 0 : index
    %c0_4 = arith.constant 0 : index
    %21 = vector.load %arg1[%c0, %c0_4] : memref<32x128xbf16, #tpu.memory_space<vmem>>, vector<32x128xbf16>
    %c0_5 = arith.constant 0 : index
    %c0_6 = arith.constant 0 : index
    %22 = vector.load %arg2[%c0_5, %c0_6] : memref<128x256xbf16, #tpu.memory_space<vmem>>, vector<128x256xbf16>
    %cst = arith.constant dense<0.000000e+00> : vector<32x256xf32>
    %23 = tpu.matmul %21, %22, %cst {dimension_numbers = #tpu.dot_dimension_numbers<[1], [0], [0], [1], [0, 0, 1, 1], [], []>} : vector<32x128xbf16>, vector<128x256xbf16>, vector<32x256xf32> -> vector<32x256xf32>
    %24 = vector.extract_strided_slice %23 {offsets = [0, 0], sizes = [32, 128], strides = [1, 1]} : vector<32x256xf32> to vector<32x128xf32>
    %c0_7 = arith.constant 0 : index
    %c0_8 = arith.constant 0 : index
    %25 = vector.load %arg3[%c0_7, %c0_8] : memref<1x128xf32, #tpu.memory_space<vmem>>, vector<1x128xf32>
    %26 = vector.broadcast %25 : vector<1x128xf32> to vector<32x128xf32>
    %27 = arith.mulf %24, %26 : vector<32x128xf32>
    %c0_9 = arith.constant 0 : index
    %c0_10 = arith.constant 0 : index
    %28 = vector.load %arg4[%c0_9, %c0_10] : memref<1x128xf32, #tpu.memory_space<vmem>>, vector<1x128xf32>
    %29 = vector.broadcast %28 : vector<1x128xf32> to vector<32x128xf32>
    %30 = arith.addf %27, %29 : vector<32x128xf32>
    %cst_11 = arith.constant 0.000000e+00 : f32
    %31 = vector.broadcast %cst_11 : f32 to vector<32x128xf32>
    %32 = arith.maximumf %30, %31 : vector<32x128xf32>
    %c1_i32_12 = arith.constant 1 : i32
    %33 = tpu.dynamic_rotate %32 by %c1_i32_12 dim 0 : vector<32x128xf32>, i32 -> vector<32x128xf32>
    %cst_13 = arith.constant 0.000000e+00 : f32
    %34 = vector.shape_cast %18 : vector<32x1xi1> to vector<32x1xi1>
    %35 = vector.broadcast %34 : vector<32x1xi1> to vector<32x128xi1>
    %36 = vector.broadcast %cst_13 : f32 to vector<32x128xf32>
    %37 = arith.select %35, %33, %36 : vector<32x128xi1>, vector<32x128xf32>
    %38 = arith.truncf %37 : vector<32x128xf32> to vector<32x128xbf16>
    %c31_i32 = arith.constant 31 : i32
    %39 = tpu.dynamic_rotate %32 by %c31_i32 dim 0 : vector<32x128xf32>, i32 -> vector<32x128xf32>
    %cst_14 = arith.constant 0.000000e+00 : f32
    %40 = vector.shape_cast %20 : vector<32x1xi1> to vector<32x1xi1>
    %41 = vector.broadcast %40 : vector<32x1xi1> to vector<32x128xi1>
    %42 = vector.broadcast %cst_14 : f32 to vector<32x128xf32>
    %43 = arith.select %41, %39, %42 : vector<32x128xi1>, vector<32x128xf32>
    %44 = arith.truncf %43 : vector<32x128xf32> to vector<32x128xbf16>
    %45 = arith.truncf %32 : vector<32x128xf32> to vector<32x128xbf16>
    %c0_15 = arith.constant 0 : index
    %c0_16 = arith.constant 0 : index
    %c0_17 = arith.constant 0 : index
    %46 = vector.load %arg5[%c0_15, %c0_16, %c0_17] : memref<3x128x128xbf16, #tpu.memory_space<vmem>>, vector<1x128x128xbf16>
    %47 = vector.shape_cast %46 : vector<1x128x128xbf16> to vector<128x128xbf16>
    %cst_18 = arith.constant dense<0.000000e+00> : vector<32x128xf32>
    %48 = tpu.matmul %38, %47, %cst_18 {dimension_numbers = #tpu.dot_dimension_numbers<[1], [0], [0], [1], [0, 0, 1, 1], [], []>} : vector<32x128xbf16>, vector<128x128xbf16>, vector<32x128xf32> -> vector<32x128xf32>
    %c1 = arith.constant 1 : index
    %c0_19 = arith.constant 0 : index
    %c0_20 = arith.constant 0 : index
    %49 = vector.load %arg5[%c1, %c0_19, %c0_20] : memref<3x128x128xbf16, #tpu.memory_space<vmem>>, vector<1x128x128xbf16>
    %50 = vector.shape_cast %49 : vector<1x128x128xbf16> to vector<128x128xbf16>
    %cst_21 = arith.constant dense<0.000000e+00> : vector<32x128xf32>
    %51 = tpu.matmul %45, %50, %cst_21 {dimension_numbers = #tpu.dot_dimension_numbers<[1], [0], [0], [1], [0, 0, 1, 1], [], []>} : vector<32x128xbf16>, vector<128x128xbf16>, vector<32x128xf32> -> vector<32x128xf32>
    %52 = arith.addf %48, %51 : vector<32x128xf32>
    %c2 = arith.constant 2 : index
    %c0_22 = arith.constant 0 : index
    %c0_23 = arith.constant 0 : index
    %53 = vector.load %arg5[%c2, %c0_22, %c0_23] : memref<3x128x128xbf16, #tpu.memory_space<vmem>>, vector<1x128x128xbf16>
    %54 = vector.shape_cast %53 : vector<1x128x128xbf16> to vector<128x128xbf16>
    %cst_24 = arith.constant dense<0.000000e+00> : vector<32x128xf32>
    %55 = tpu.matmul %44, %54, %cst_24 {dimension_numbers = #tpu.dot_dimension_numbers<[1], [0], [0], [1], [0, 0, 1, 1], [], []>} : vector<32x128xbf16>, vector<128x128xbf16>, vector<32x128xf32> -> vector<32x128xf32>
    %56 = arith.addf %52, %55 : vector<32x128xf32>
    %57 = vector.extract_strided_slice %23 {offsets = [0, 128], sizes = [32, 128], strides = [1, 1]} : vector<32x256xf32> to vector<32x128xf32>
    %c0_25 = arith.constant 0 : index
    %c0_26 = arith.constant 0 : index
    %58 = vector.load %arg8[%c0_25, %c0_26] : memref<1x128xf32, #tpu.memory_space<vmem>>, vector<1x128xf32>
    %59 = vector.broadcast %58 : vector<1x128xf32> to vector<32x128xf32>
    %60 = arith.mulf %57, %59 : vector<32x128xf32>
    %c0_27 = arith.constant 0 : index
    %c0_28 = arith.constant 0 : index
    %61 = vector.load %arg9[%c0_27, %c0_28] : memref<1x128xf32, #tpu.memory_space<vmem>>, vector<1x128xf32>
    %62 = vector.broadcast %61 : vector<1x128xf32> to vector<32x128xf32>
    %63 = arith.addf %60, %62 : vector<32x128xf32>
    %c0_29 = arith.constant 0 : index
    %c0_30 = arith.constant 0 : index
    %64 = vector.load %arg6[%c0_29, %c0_30] : memref<1x128xf32, #tpu.memory_space<vmem>>, vector<1x128xf32>
    %65 = vector.broadcast %64 : vector<1x128xf32> to vector<32x128xf32>
    %66 = arith.mulf %56, %65 : vector<32x128xf32>
    %c0_31 = arith.constant 0 : index
    %c0_32 = arith.constant 0 : index
    %67 = vector.load %arg7[%c0_31, %c0_32] : memref<1x128xf32, #tpu.memory_space<vmem>>, vector<1x128xf32>
    %68 = vector.broadcast %67 : vector<1x128xf32> to vector<32x128xf32>
    %69 = arith.addf %66, %68 : vector<32x128xf32>
    %70 = arith.addf %69, %63 : vector<32x128xf32>
    %cst_33 = arith.constant 0.000000e+00 : f32
    %71 = vector.broadcast %cst_33 : f32 to vector<32x128xf32>
    %72 = arith.maximumf %70, %71 : vector<32x128xf32>
    %73 = arith.truncf %72 : vector<32x128xf32> to vector<32x128xbf16>
    %c0_34 = arith.constant 0 : index
    %c0_35 = arith.constant 0 : index
    %74 = vector.load %arg10[%c0_34, %c0_35] : memref<32x128xbf16, #tpu.memory_space<vmem>>, vector<32x128xbf16>
    tpu.vector_store %arg10[%c0_34, %c0_35], %73 {strides = array<i32>} : memref<32x128xbf16, #tpu.memory_space<vmem>>, vector<32x128xbf16>,
    return
  }
  func.func @transform_0(%arg0: i32) -> (i32, i32) {
    %c0_i32 = arith.constant 0 : i32
    %c0_i32_0 = arith.constant 0 : i32
    return %arg0, %c0_i32 : i32, i32
  }
  func.func @transform_1(%arg0: i32) -> (i32, i32) {
    %c0_i32 = arith.constant 0 : i32
    %c0_i32_0 = arith.constant 0 : i32
    %c0_i32_1 = arith.constant 0 : i32
    return %c0_i32, %c0_i32_0 : i32, i32
  }
  func.func @transform_2(%arg0: i32) -> (i32, i32) {
    %c0_i32 = arith.constant 0 : i32
    %c0_i32_0 = arith.constant 0 : i32
    %c0_i32_1 = arith.constant 0 : i32
    return %c0_i32, %c0_i32_0 : i32, i32
  }
  func.func @transform_3(%arg0: i32) -> (i32, i32) {
    %c0_i32 = arith.constant 0 : i32
    %c0_i32_0 = arith.constant 0 : i32
    %c0_i32_1 = arith.constant 0 : i32
    return %c0_i32, %c0_i32_0 : i32, i32
  }
  func.func @transform_4(%arg0: i32) -> (i32, i32, i32) {
    %c0_i32 = arith.constant 0 : i32
    %c0_i32_0 = arith.constant 0 : i32
    %c0_i32_1 = arith.constant 0 : i32
    %c0_i32_2 = arith.constant 0 : i32
    return %c0_i32, %c0_i32_0, %c0_i32_1 : i32, i32, i32
  }
  func.func @transform_5(%arg0: i32) -> (i32, i32) {
    %c0_i32 = arith.constant 0 : i32
    %c0_i32_0 = arith.constant 0 : i32
    %c0_i32_1 = arith.constant 0 : i32
    return %c0_i32, %c0_i32_0 : i32, i32
  }
  func.func @transform_6(%arg0: i32) -> (i32, i32) {
    %c0_i32 = arith.constant 0 : i32
    %c0_i32_0 = arith.constant 0 : i32
    %c0_i32_1 = arith.constant 0 : i32
    return %c0_i32, %c0_i32_0 : i32, i32
  }
  func.func @transform_7(%arg0: i32) -> (i32, i32) {
    %c0_i32 = arith.constant 0 : i32
    %c0_i32_0 = arith.constant 0 : i32
    %c0_i32_1 = arith.constant 0 : i32
    return %c0_i32, %c0_i32_0 : i32, i32
  }
  func.func @transform_8(%arg0: i32) -> (i32, i32) {
    %c0_i32 = arith.constant 0 : i32
    %c0_i32_0 = arith.constant 0 : i32
    %c0_i32_1 = arith.constant 0 : i32
    return %c0_i32, %c0_i32_0 : i32, i32
  }
  func.func @transform_9(%arg0: i32) -> (i32, i32) {
    %c0_i32 = arith.constant 0 : i32
    %c0_i32_0 = arith.constant 0 : i32
    return %arg0, %c0_i32 : i32, i32
  }
}

module attributes {stable_mosaic.version = 11 : i64} {
  func.func @kernel(%arg0: i32, %arg1: memref<32x128xbf16, #tpu.memory_space<vmem>>, %arg2: memref<128x256xbf16, #tpu.memory_space<vmem>>, %arg3: memref<1x128xf32, #tpu.memory_space<vmem>>, %arg4: memref<1x128xf32, #tpu.memory_space<vmem>>, %arg5: memref<3x128x128xbf16, #tpu.memory_space<vmem>>, %arg6: memref<1x256xf32, #tpu.memory_space<vmem>>) attributes {dimension_semantics = [#tpu.dimension_semantics<arbitrary>], iteration_bounds = array<i64: 1>, scalar_prefetch = 0 : i64, scratch_operands = 0 : i64, tpu.core_type = #tpu.core_type<tc>, window_params = [{transform_indices = @transform_0, window_bounds = array<i64: 32, 128>}, {pipeline_mode = #tpu.pipeline_mode<synchronous>, transform_indices = @transform_1, window_bounds = array<i64: 128, 256>}, {pipeline_mode = #tpu.pipeline_mode<synchronous>, transform_indices = @transform_2, window_bounds = array<i64: 1, 128>}, {pipeline_mode = #tpu.pipeline_mode<synchronous>, transform_indices = @transform_3, window_bounds = array<i64: 1, 128>}, {pipeline_mode = #tpu.pipeline_mode<synchronous>, transform_indices = @transform_4, window_bounds = array<i64: 3, 128, 128>}, {pipeline_mode = #tpu.pipeline_mode<synchronous>, transform_indices = @transform_5, window_bounds = array<i64: 1, 256>}]} {
    %0 = tpu.iota {dimensions = array<i32: 0>} : vector<32x1xi32>
    %c16_i32 = arith.constant 16 : i32
    %c0_i32 = arith.constant 0 : i32
    %1 = arith.cmpi eq, %c16_i32, %c0_i32 : i32
    %c1_i32 = arith.constant 1 : i32
    %2 = arith.select %1, %c1_i32, %c16_i32 : i32
    %3 = vector.broadcast %2 : i32 to vector<32x1xi32>
    %4 = arith.remsi %0, %3 : vector<32x1xi32>
    %c0_i32_0 = arith.constant 0 : i32
    %5 = vector.broadcast %c0_i32_0 : i32 to vector<32x1xi32>
    %6 = arith.cmpi ne, %4, %5 : vector<32x1xi32>
    %c0_i32_1 = arith.constant 0 : i32
    %7 = vector.broadcast %c0_i32_1 : i32 to vector<32x1xi32>
    %8 = arith.cmpi slt, %4, %7 : vector<32x1xi32>
    %c0_i32_2 = arith.constant 0 : i32
    %9 = arith.cmpi slt, %2, %c0_i32_2 : i32
    %10 = vector.broadcast %9 : i1 to vector<32x1xi1>
    %11 = vector.broadcast %10 : vector<32x1xi1> to vector<32x1xi1>
    %12 = arith.xori %8, %11 : vector<32x1xi1>
    %13 = arith.andi %12, %6 : vector<32x1xi1>
    %14 = vector.broadcast %2 : i32 to vector<32x1xi32>
    %15 = arith.addi %4, %14 : vector<32x1xi32>
    %16 = arith.select %13, %15, %4 : vector<32x1xi1>, vector<32x1xi32>
    %c0_i32_3 = arith.constant 0 : i32
    %17 = vector.broadcast %c0_i32_3 : i32 to vector<32x1xi32>
    %18 = arith.cmpi ne, %16, %17 : vector<32x1xi32>
    %c15_i32 = arith.constant 15 : i32
    %19 = vector.broadcast %c15_i32 : i32 to vector<32x1xi32>
    %20 = arith.cmpi ne, %16, %19 : vector<32x1xi32>
    %c0 = arith.constant 0 : index
    %c0_4 = arith.constant 0 : index
    %21 = vector.load %arg1[%c0, %c0_4] : memref<32x128xbf16, #tpu.memory_space<vmem>>, vector<32x128xbf16>
    %c0_5 = arith.constant 0 : index
    %c0_6 = arith.constant 0 : index
    %22 = vector.load %arg2[%c0_5, %c0_6] : memref<128x256xbf16, #tpu.memory_space<vmem>>, vector<128x256xbf16>
    %cst = arith.constant dense<0.000000e+00> : vector<32x256xf32>
    %23 = tpu.matmul %21, %22, %cst {dimension_numbers = #tpu.dot_dimension_numbers<[1], [0], [0], [1], [0, 0, 1, 1], [], []>} : vector<32x128xbf16>, vector<128x256xbf16>, vector<32x256xf32> -> vector<32x256xf32>
    %24 = vector.extract_strided_slice %23 {offsets = [0, 0], sizes = [32, 128], strides = [1, 1]} : vector<32x256xf32> to vector<32x128xf32>
    %c0_7 = arith.constant 0 : index
    %c0_8 = arith.constant 0 : index
    %25 = vector.load %arg3[%c0_7, %c0_8] : memref<1x128xf32, #tpu.memory_space<vmem>>, vector<1x128xf32>
    %26 = vector.broadcast %25 : vector<1x128xf32> to vector<32x128xf32>
    %27 = arith.mulf %24, %26 : vector<32x128xf32>
    %c0_9 = arith.constant 0 : index
    %c0_10 = arith.constant 0 : index
    %28 = vector.load %arg4[%c0_9, %c0_10] : memref<1x128xf32, #tpu.memory_space<vmem>>, vector<1x128xf32>
    %29 = vector.broadcast %28 : vector<1x128xf32> to vector<32x128xf32>
    %30 = arith.addf %27, %29 : vector<32x128xf32>
    %cst_11 = arith.constant 0.000000e+00 : f32
    %31 = vector.broadcast %cst_11 : f32 to vector<32x128xf32>
    %32 = arith.maximumf %30, %31 : vector<32x128xf32>
    %c1_i32_12 = arith.constant 1 : i32
    %33 = tpu.dynamic_rotate %32 by %c1_i32_12 dim 0 : vector<32x128xf32>, i32 -> vector<32x128xf32>
    %cst_13 = arith.constant 0.000000e+00 : f32
    %34 = vector.shape_cast %18 : vector<32x1xi1> to vector<32x1xi1>
    %35 = vector.broadcast %34 : vector<32x1xi1> to vector<32x128xi1>
    %36 = vector.broadcast %cst_13 : f32 to vector<32x128xf32>
    %37 = arith.select %35, %33, %36 : vector<32x128xi1>, vector<32x128xf32>
    %38 = arith.truncf %37 : vector<32x128xf32> to vector<32x128xbf16>
    %c31_i32 = arith.constant 31 : i32
    %39 = tpu.dynamic_rotate %32 by %c31_i32 dim 0 : vector<32x128xf32>, i32 -> vector<32x128xf32>
    %cst_14 = arith.constant 0.000000e+00 : f32
    %40 = vector.shape_cast %20 : vector<32x1xi1> to vector<32x1xi1>
    %41 = vector.broadcast %40 : vector<32x1xi1> to vector<32x128xi1>
    %42 = vector.broadcast %cst_14 : f32 to vector<32x128xf32>
    %43 = arith.select %41, %39, %42 : vector<32x128xi1>, vector<32x128xf32>
    %44 = arith.truncf %43 : vector<32x128xf32> to vector<32x128xbf16>
    %45 = arith.truncf %32 : vector<32x128xf32> to vector<32x128xbf16>
    %c0_15 = arith.constant 0 : index
    %c0_16 = arith.constant 0 : index
    %c0_17 = arith.constant 0 : index
    %46 = vector.load %arg5[%c0_15, %c0_16, %c0_17] : memref<3x128x128xbf16, #tpu.memory_space<vmem>>, vector<1x128x128xbf16>
    %47 = vector.shape_cast %46 : vector<1x128x128xbf16> to vector<128x128xbf16>
    %cst_18 = arith.constant dense<0.000000e+00> : vector<32x128xf32>
    %48 = tpu.matmul %38, %47, %cst_18 {dimension_numbers = #tpu.dot_dimension_numbers<[1], [0], [0], [1], [0, 0, 1, 1], [], []>} : vector<32x128xbf16>, vector<128x128xbf16>, vector<32x128xf32> -> vector<32x128xf32>
    %c1 = arith.constant 1 : index
    %c0_19 = arith.constant 0 : index
    %c0_20 = arith.constant 0 : index
    %49 = vector.load %arg5[%c1, %c0_19, %c0_20] : memref<3x128x128xbf16, #tpu.memory_space<vmem>>, vector<1x128x128xbf16>
    %50 = vector.shape_cast %49 : vector<1x128x128xbf16> to vector<128x128xbf16>
    %cst_21 = arith.constant dense<0.000000e+00> : vector<32x128xf32>
    %51 = tpu.matmul %45, %50, %cst_21 {dimension_numbers = #tpu.dot_dimension_numbers<[1], [0], [0], [1], [0, 0, 1, 1], [], []>} : vector<32x128xbf16>, vector<128x128xbf16>, vector<32x128xf32> -> vector<32x128xf32>
    %52 = arith.addf %48, %51 : vector<32x128xf32>
    %c2 = arith.constant 2 : index
    %c0_22 = arith.constant 0 : index
    %c0_23 = arith.constant 0 : index
    %53 = vector.load %arg5[%c2, %c0_22, %c0_23] : memref<3x128x128xbf16, #tpu.memory_space<vmem>>, vector<1x128x128xbf16>
    %54 = vector.shape_cast %53 : vector<1x128x128xbf16> to vector<128x128xbf16>
    %cst_24 = arith.constant dense<0.000000e+00> : vector<32x128xf32>
    %55 = tpu.matmul %44, %54, %cst_24 {dimension_numbers = #tpu.dot_dimension_numbers<[1], [0], [0], [1], [0, 0, 1, 1], [], []>} : vector<32x128xbf16>, vector<128x128xbf16>, vector<32x128xf32> -> vector<32x128xf32>
    %56 = arith.addf %52, %55 : vector<32x128xf32>
    %57 = tpu.iota {dimensions = array<i32: 0>} : vector<32x1xi32>
    %c32_i32 = arith.constant 32 : i32
    %58 = arith.muli %arg0, %c32_i32 : i32
    %59 = vector.broadcast %58 : i32 to vector<32x1xi32>
    %60 = arith.addi %57, %59 : vector<32x1xi32>
    %c32_i32_25 = arith.constant 32 : i32
    %61 = vector.broadcast %c32_i32_25 : i32 to vector<32x1xi32>
    %62 = arith.cmpi slt, %60, %61 : vector<32x1xi32>
    %63 = arith.extui %62 : vector<32x1xi1> to vector<32x1xi32>
    %64 = arith.sitofp %63 : vector<32x1xi32> to vector<32x1xf32>
    %c0_i32_26 = arith.constant 0 : i32
    %65 = arith.cmpi eq, %arg0, %c0_i32_26 : i32
    %66 = arith.extui %65 : i1 to i32
    %c0_i32_27 = arith.constant 0 : i32
    %67 = arith.cmpi ne, %66, %c0_i32_27 : i32
    scf.if %67 {
      %cst_37 = arith.constant 0.000000e+00 : f32
      %83 = vector.broadcast %cst_37 : f32 to vector<1x256xf32>
      %c0_38 = arith.constant 0 : index
      %c0_39 = arith.constant 0 : index
      %84 = vector.load %arg6[%c0_38, %c0_39] : memref<1x256xf32, #tpu.memory_space<vmem>>, vector<1x256xf32>
      tpu.vector_store %arg6[%c0_38, %c0_39], %83 {strides = array<i32>} : memref<1x256xf32, #tpu.memory_space<vmem>>, vector<1x256xf32>,
    } else {
    }
    %c0_28 = arith.constant 0 : index
    %c0_29 = arith.constant 0 : index
    %68 = vector.load %arg6[%c0_28, %c0_29] : memref<1x256xf32, #tpu.memory_space<vmem>>, vector<1x128xf32>
    %69 = vector.broadcast %64 : vector<32x1xf32> to vector<32x128xf32>
    %70 = arith.mulf %56, %69 : vector<32x128xf32>
    %cst_30 = arith.constant dense<0.000000e+00> : vector<128xf32>
    %71 = vector.multi_reduction <add>, %70, %cst_30 [0] : vector<32x128xf32> to vector<128xf32>
    %72 = vector.shape_cast %71 : vector<128xf32> to vector<1x128xf32>
    %73 = arith.addf %68, %72 : vector<1x128xf32>
    %c0_31 = arith.constant 0 : index
    %c0_32 = arith.constant 0 : index
    %74 = vector.load %arg6[%c0_31, %c0_32] : memref<1x256xf32, #tpu.memory_space<vmem>>, vector<1x128xf32>
    tpu.vector_store %arg6[%c0_31, %c0_32], %73 {strides = array<i32>} : memref<1x256xf32, #tpu.memory_space<vmem>>, vector<1x128xf32>,
    %c0_33 = arith.constant 0 : index
    %c128 = arith.constant 128 : index
    %75 = vector.load %arg6[%c0_33, %c128] : memref<1x256xf32, #tpu.memory_space<vmem>>, vector<1x128xf32>
    %76 = arith.mulf %56, %56 : vector<32x128xf32>
    %77 = vector.broadcast %64 : vector<32x1xf32> to vector<32x128xf32>
    %78 = arith.mulf %76, %77 : vector<32x128xf32>
    %cst_34 = arith.constant dense<0.000000e+00> : vector<128xf32>
    %79 = vector.multi_reduction <add>, %78, %cst_34 [0] : vector<32x128xf32> to vector<128xf32>
    %80 = vector.shape_cast %79 : vector<128xf32> to vector<1x128xf32>
    %81 = arith.addf %75, %80 : vector<1x128xf32>
    %c0_35 = arith.constant 0 : index
    %c128_36 = arith.constant 128 : index
    %82 = vector.load %arg6[%c0_35, %c128_36] : memref<1x256xf32, #tpu.memory_space<vmem>>, vector<1x128xf32>
    tpu.vector_store %arg6[%c0_35, %c128_36], %81 {strides = array<i32>} : memref<1x256xf32, #tpu.memory_space<vmem>>, vector<1x128xf32>,
    return
  }
  func.func @transform_0(%arg0: i32) -> (i32, i32) {
    %c0_i32 = arith.constant 0 : i32
    %c0_i32_0 = arith.constant 0 : i32
    return %arg0, %c0_i32 : i32, i32
  }
  func.func @transform_1(%arg0: i32) -> (i32, i32) {
    %c0_i32 = arith.constant 0 : i32
    %c0_i32_0 = arith.constant 0 : i32
    %c0_i32_1 = arith.constant 0 : i32
    return %c0_i32, %c0_i32_0 : i32, i32
  }
  func.func @transform_2(%arg0: i32) -> (i32, i32) {
    %c0_i32 = arith.constant 0 : i32
    %c0_i32_0 = arith.constant 0 : i32
    %c0_i32_1 = arith.constant 0 : i32
    return %c0_i32, %c0_i32_0 : i32, i32
  }
  func.func @transform_3(%arg0: i32) -> (i32, i32) {
    %c0_i32 = arith.constant 0 : i32
    %c0_i32_0 = arith.constant 0 : i32
    %c0_i32_1 = arith.constant 0 : i32
    return %c0_i32, %c0_i32_0 : i32, i32
  }
  func.func @transform_4(%arg0: i32) -> (i32, i32, i32) {
    %c0_i32 = arith.constant 0 : i32
    %c0_i32_0 = arith.constant 0 : i32
    %c0_i32_1 = arith.constant 0 : i32
    %c0_i32_2 = arith.constant 0 : i32
    return %c0_i32, %c0_i32_0, %c0_i32_1 : i32, i32, i32
  }
  func.func @transform_5(%arg0: i32) -> (i32, i32) {
    %c0_i32 = arith.constant 0 : i32
    %c0_i32_0 = arith.constant 0 : i32
    %c0_i32_1 = arith.constant 0 : i32
    return %c0_i32, %c0_i32_0 : i32, i32
  }
}

module attributes {stable_mosaic.version = 11 : i64} {
  func.func @kernel(%arg0: i32, %arg1: memref<32x128xbf16, #tpu.memory_space<vmem>>, %arg2: memref<128x256xbf16, #tpu.memory_space<vmem>>, %arg3: memref<1x512xf32, #tpu.memory_space<vmem>>) attributes {dimension_semantics = [#tpu.dimension_semantics<arbitrary>], iteration_bounds = array<i64: 1>, scalar_prefetch = 0 : i64, scratch_operands = 0 : i64, tpu.core_type = #tpu.core_type<tc>, window_params = [{transform_indices = @transform_0, window_bounds = array<i64: 32, 128>}, {pipeline_mode = #tpu.pipeline_mode<synchronous>, transform_indices = @transform_1, window_bounds = array<i64: 128, 256>}, {pipeline_mode = #tpu.pipeline_mode<synchronous>, transform_indices = @transform_2, window_bounds = array<i64: 1, 512>}]} {
    %c0 = arith.constant 0 : index
    %c0_0 = arith.constant 0 : index
    %0 = vector.load %arg1[%c0, %c0_0] : memref<32x128xbf16, #tpu.memory_space<vmem>>, vector<32x128xbf16>
    %c0_1 = arith.constant 0 : index
    %c0_2 = arith.constant 0 : index
    %1 = vector.load %arg2[%c0_1, %c0_2] : memref<128x256xbf16, #tpu.memory_space<vmem>>, vector<128x256xbf16>
    %cst = arith.constant dense<0.000000e+00> : vector<32x256xf32>
    %2 = tpu.matmul %0, %1, %cst {dimension_numbers = #tpu.dot_dimension_numbers<[1], [0], [0], [1], [0, 0, 1, 1], [], []>} : vector<32x128xbf16>, vector<128x256xbf16>, vector<32x256xf32> -> vector<32x256xf32>
    %3 = tpu.iota {dimensions = array<i32: 0>} : vector<32x1xi32>
    %c32_i32 = arith.constant 32 : i32
    %4 = arith.muli %arg0, %c32_i32 : i32
    %5 = vector.broadcast %4 : i32 to vector<32x1xi32>
    %6 = arith.addi %3, %5 : vector<32x1xi32>
    %c32_i32_3 = arith.constant 32 : i32
    %7 = vector.broadcast %c32_i32_3 : i32 to vector<32x1xi32>
    %8 = arith.cmpi slt, %6, %7 : vector<32x1xi32>
    %9 = arith.extui %8 : vector<32x1xi1> to vector<32x1xi32>
    %10 = arith.sitofp %9 : vector<32x1xi32> to vector<32x1xf32>
    %c0_i32 = arith.constant 0 : i32
    %11 = arith.cmpi eq, %arg0, %c0_i32 : i32
    %12 = arith.extui %11 : i1 to i32
    %c0_i32_4 = arith.constant 0 : i32
    %13 = arith.cmpi ne, %12, %c0_i32_4 : i32
    scf.if %13 {
      %cst_14 = arith.constant 0.000000e+00 : f32
      %29 = vector.broadcast %cst_14 : f32 to vector<1x512xf32>
      %c0_15 = arith.constant 0 : index
      %c0_16 = arith.constant 0 : index
      %30 = vector.load %arg3[%c0_15, %c0_16] : memref<1x512xf32, #tpu.memory_space<vmem>>, vector<1x512xf32>
      tpu.vector_store %arg3[%c0_15, %c0_16], %29 {strides = array<i32>} : memref<1x512xf32, #tpu.memory_space<vmem>>, vector<1x512xf32>,
    } else {
    }
    %c0_5 = arith.constant 0 : index
    %c0_6 = arith.constant 0 : index
    %14 = vector.load %arg3[%c0_5, %c0_6] : memref<1x512xf32, #tpu.memory_space<vmem>>, vector<1x256xf32>
    %15 = vector.broadcast %10 : vector<32x1xf32> to vector<32x256xf32>
    %16 = arith.mulf %2, %15 : vector<32x256xf32>
    %cst_7 = arith.constant dense<0.000000e+00> : vector<256xf32>
    %17 = vector.multi_reduction <add>, %16, %cst_7 [0] : vector<32x256xf32> to vector<256xf32>
    %18 = vector.shape_cast %17 : vector<256xf32> to vector<1x256xf32>
    %19 = arith.addf %14, %18 : vector<1x256xf32>
    %c0_8 = arith.constant 0 : index
    %c0_9 = arith.constant 0 : index
    %20 = vector.load %arg3[%c0_8, %c0_9] : memref<1x512xf32, #tpu.memory_space<vmem>>, vector<1x256xf32>
    tpu.vector_store %arg3[%c0_8, %c0_9], %19 {strides = array<i32>} : memref<1x512xf32, #tpu.memory_space<vmem>>, vector<1x256xf32>,
    %c0_10 = arith.constant 0 : index
    %c256 = arith.constant 256 : index
    %21 = vector.load %arg3[%c0_10, %c256] : memref<1x512xf32, #tpu.memory_space<vmem>>, vector<1x256xf32>
    %22 = arith.mulf %2, %2 : vector<32x256xf32>
    %23 = vector.broadcast %10 : vector<32x1xf32> to vector<32x256xf32>
    %24 = arith.mulf %22, %23 : vector<32x256xf32>
    %cst_11 = arith.constant dense<0.000000e+00> : vector<256xf32>
    %25 = vector.multi_reduction <add>, %24, %cst_11 [0] : vector<32x256xf32> to vector<256xf32>
    %26 = vector.shape_cast %25 : vector<256xf32> to vector<1x256xf32>
    %27 = arith.addf %21, %26 : vector<1x256xf32>
    %c0_12 = arith.constant 0 : index
    %c256_13 = arith.constant 256 : index
    %28 = vector.load %arg3[%c0_12, %c256_13] : memref<1x512xf32, #tpu.memory_space<vmem>>, vector<1x256xf32>
    tpu.vector_store %arg3[%c0_12, %c256_13], %27 {strides = array<i32>} : memref<1x512xf32, #tpu.memory_space<vmem>>, vector<1x256xf32>,
    return
  }
  func.func @transform_0(%arg0: i32) -> (i32, i32) {
    %c0_i32 = arith.constant 0 : i32
    %c0_i32_0 = arith.constant 0 : i32
    return %arg0, %c0_i32 : i32, i32
  }
  func.func @transform_1(%arg0: i32) -> (i32, i32) {
    %c0_i32 = arith.constant 0 : i32
    %c0_i32_0 = arith.constant 0 : i32
    %c0_i32_1 = arith.constant 0 : i32
    return %c0_i32, %c0_i32_0 : i32, i32
  }
  func.func @transform_2(%arg0: i32) -> (i32, i32) {
    %c0_i32 = arith.constant 0 : i32
    %c0_i32_0 = arith.constant 0 : i32
    %c0_i32_1 = arith.constant 0 : i32
    return %c0_i32, %c0_i32_0 : i32, i32
  }
}

</mosaic_0001>

<bundles_post_ra>
// kernel: basic_block_pallas.3
= control target key start
LH: loop header
LB: loop body
LE: loop exit
PB: predicated region body
PF: predicated region fallthrough
CT: control target
= control target key end

     0   :  { %v382_v1 = vmov 0   ;;  %v204_v19 = vlaneseq  ;;  %v383_v20 = vmov 0.0   ;;  %v384_v53 = vmov 1966171168   ;;  %s472_s1 = inlined_call_operand.vmem [shape: bf16[128,256], index: 1, kind: input, shape index: {}]   ;;  %s473_s0 = inlined_call_operand.vmem [shape: bf16[32,128], index: 0, kind: input, shape index: {}]   ;;  %s474_s2 = inlined_call_operand.vmem [shape: f32[1,512], index: 2, kind: output, shape index: {}]  }
   0x1   :  { %v356_v0 = vld [vmem:[%s472_s1 + $0x74] ss:$8 sps:$4 sm:$0xff]   ;;  %156 = vmatprep.mubr.bf16.mxu0 %v382_v1  ;;  %166 = vmatprep.mubr.bf16.mxu1 %v382_v1  ;;  %v358_v2 = vld [vmem:[%s472_s1 + $0x70] ss:$8 sps:$4 sm:$0xff]   ;;  %v359_v3 = vld [vmem:[%s472_s1 + $0x64] ss:$8 sps:$4 sm:$0xff]   ;;  %v240_v54 = vunpack.c.l.s4 %v384_v53 }
   0x2   :  { %124 = vmatprep.subr.bf16.mxu0 %v356_v0  ;;  %337 = vmatprep.subr.bf16.mxu1 %v356_v0  ;;  %v361_v4 = vld [vmem:[%s472_s1 + $0x60] ss:$8 sps:$4 sm:$0xff]   ;;  %v362_v5 = vld [vmem:[%s472_s1 + $0x54] ss:$8 sps:$4 sm:$0xff]   ;;  %v364_v6 = vld [vmem:[%s472_s1 + $0x50] ss:$8 sps:$4 sm:$0xff]  }
   0x3   :  { %125 = vmatpush1.bf16.msra.mxu0 %v358_v2  ;;  %345 = vmatpush1.bf16.msra.mxu1 %v358_v2  ;;  %v365_v7 = vld [vmem:[%s472_s1 + $0x44] ss:$8 sps:$4 sm:$0xff]   ;;  %v367_v8 = vld [vmem:[%s472_s1 + $0x40] ss:$8 sps:$4 sm:$0xff]   ;;  %v368_v9 = vld [vmem:[%s472_s1 + $0x34] ss:$8 sps:$4 sm:$0xff]   ;;  %v241_v63 = vunpack.c.0.s8 %v240_v54 }
   0x4   :  { %126 = vmatprep.subr.bf16.mxu0 %v359_v3  ;;  %338 = vmatprep.subr.bf16.mxu1 %v359_v3  ;;  %v370_v10 = vld [vmem:[%s472_s1 + $0x30] ss:$8 sps:$4 sm:$0xff]   ;;  %v371_v11 = vld [vmem:[%s472_s1 + $0x24] ss:$8 sps:$4 sm:$0xff]   ;;  %v373_v12 = vld [vmem:[%s472_s1 + $0x20] ss:$8 sps:$4 sm:$0xff]  }
   0x5   :  { %v374_v13 = vld [vmem:[%s472_s1 + $0x14] ss:$8 sps:$4 sm:$0xff]   ;;  %v376_v14 = vld [vmem:[%s472_s1 + $0x10] ss:$8 sps:$4 sm:$0xff]   ;;  %v377_v15 = vld [vmem:[%s472_s1 + $0x4] ss:$8 sps:$4 sm:$0xff]  }
   0x6   :  { %v379_v16 = vld [vmem:[%s472_s1] ss:$8 sps:$4 sm:$0xff]   ;;  %vm206_vm0 = vcmp.lt.s32.totalorder %v204_v19, 512  ;;  %v243_v0 = vshrl.u32 %v204_v19, 7  ;;  %vm257_vm1 = vcmp.lt.s32.totalorder %v204_v19, 256 }
   0x7   :  { %127 = vmatpush1.bf16.msra.mxu0 %v361_v4  ;;  %346 = vmatpush1.bf16.msra.mxu1 %v361_v4  ;;  %v380_v17 = vld [vmem:[%s473_s0] sm:$0xff]   ;;  %v381_v18 = vld [vmem:[%s473_s0 + $0x8] sm:$0xff]   ;;  %208 = vst.msk [vmem:[%s474_s2] sm:$0xf] %vm206_vm0, %v383_v20 }
   0x8   :  { %128 = vmatprep.subr.bf16.mxu0 %v362_v5  ;;  %339 = vmatprep.subr.bf16.mxu1 %v362_v5 }
   0xb   :  { %129 = vmatpush1.bf16.msra.mxu0 %v364_v6  ;;  %347 = vmatpush1.bf16.msra.mxu1 %v364_v6 }
   0xc   :  { %130 = vmatprep.subr.bf16.mxu0 %v365_v7  ;;  %340 = vmatprep.subr.bf16.mxu1 %v365_v7 }
   0xf   :  { %131 = vmatpush1.bf16.msra.mxu0 %v367_v8  ;;  %348 = vmatpush1.bf16.msra.mxu1 %v367_v8 }
  0x10   :  { %132 = vmatprep.subr.bf16.mxu0 %v368_v9  ;;  %341 = vmatprep.subr.bf16.mxu1 %v368_v9 }
  0x13   :  { %133 = vmatpush1.bf16.msra.mxu0 %v370_v10  ;;  %349 = vmatpush1.bf16.msra.mxu1 %v370_v10  ;;  %v244_v10 = vsub.s32 %v241_v63, %v243_v0 }
  0x14   :  { %134 = vmatprep.subr.bf16.mxu0 %v371_v11  ;;  %342 = vmatprep.subr.bf16.mxu1 %v371_v11 }
  0x17   :  { %135 = vmatpush1.bf16.msra.mxu0 %v373_v12  ;;  %350 = vmatpush1.bf16.msra.mxu1 %v373_v12 }
  0x18   :  { %136 = vmatprep.subr.bf16.mxu0 %v374_v13  ;;  %343 = vmatprep.subr.bf16.mxu1 %v374_v13 }
  0x1b   :  { %137 = vmatpush1.bf16.msra.mxu0 %v376_v14  ;;  %351 = vmatpush1.bf16.msra.mxu1 %v376_v14 }
  0x1c   :  { %138 = vmatprep.subr.bf16.mxu0 %v377_v15  ;;  %344 = vmatprep.subr.bf16.mxu1 %v377_v15 }
  0x1f   :  { %139 = vmatpush1.bf16.msra.mxu0 %v379_v16  ;;  %352 = vmatpush1.bf16.msra.mxu1 %v379_v16 }
  0x22   :  { %157 = vmatmul.mubr.bf16.vlgmr.msra.gmra.mxu0 %v380_v17  ;;  %167 = vmatmul.mubr.bf16.vlgmr.msra.gmra.mxu1 %v381_v18  ;;  %v209_v17 = vld [vmem:[%s474_s2] sm:$0x3] }
  0xe2   :  { %v158_v21 = vpop.f32.mrf.mxu0  ;;  %v168_v22 = vpop.f32.mrf.mxu1 }
  0xe3   :  { %v261_v27 = vmul.f32 %v158_v21, %v158_v21  ;;  %v265_v30 = vmul.f32 %v168_v22, %v168_v22 }
  0xe4   :  { %v160_v23 = vpop.f32.mrf.mxu0  ;;  %v170_v24 = vpop.f32.mrf.mxu1 }
  0xe5   :  { %v262_v31 = vmul.f32 %v160_v23, %v160_v23  ;;  %v266_v38 = vmul.f32 %v170_v24, %v170_v24 }
  0xe6   :  { %v162_v25 = vpop.f32.mrf.mxu0  ;;  %v172_v26 = vpop.f32.mrf.mxu1 }
  0xe7   :  { %v218_v28 = vadd.f32 %v162_v25, %v158_v21  ;;  %v263_v29 = vmul.f32 %v162_v25, %v162_v25  ;;  %v267_v39 = vmul.f32 %v172_v26, %v172_v26  ;;  %v260_v21 = vld [vmem:[%s474_s2 + $0x2] sm:$0x3] }
  0xe8   :  { %v164_v32 = vpop.f32.mrf.mxu0  ;;  %v174_v37 = vpop.f32.mrf.mxu1 }
  0xe9   :  { %v277_v33 = vadd.f32 %v263_v29, %v261_v27  ;;  %v219_v34 = vadd.f32 %v218_v28, %v168_v22  ;;  %v227_v35 = vadd.f32 %v164_v32, %v160_v23  ;;  %v264_v36 = vmul.f32 %v164_v32, %v164_v32 }
  0xea   :  { %v268_v44 = vmul.f32 %v174_v37, %v174_v37 }
  0xeb   :  { %v220_v40 = vadd.f32 %v219_v34, %v172_v26  ;;  %v278_v41 = vadd.f32 %v277_v33, %v265_v30  ;;  %v286_v42 = vadd.f32 %v264_v36, %v262_v31  ;;  %v228_v43 = vadd.f32 %v227_v35, %v170_v24 }
  0xed   :  { %v221_v45 = vrot.slane %v220_v40, 4  ;;  %v279_v46 = vadd.f32 %v278_v41, %v267_v39  ;;  %v229_v47 = vadd.f32 %v228_v43, %v174_v37  ;;  %v287_v48 = vadd.f32 %v286_v42, %v266_v38 }
  0xef   :  { %v222_v49 = vadd.f32 %v221_v45, %v220_v40  ;;  %v280_v50 = vrot.slane %v279_v46, 4  ;;  %v230_v51 = vrot.slane %v229_v47, 4  ;;  %v288_v52 = vadd.f32 %v287_v48, %v268_v44 }
  0xf1   :  { %v223_v55 = vrot.slane %v222_v49, 2  ;;  %v281_v56 = vadd.f32 %v280_v50, %v279_v46  ;;  %v231_v57 = vadd.f32 %v230_v51, %v229_v47  ;;  %v289_v58 = vrot.slane %v288_v52, 4 }
  0xf3   :  { %v224_v59 = vadd.f32 %v223_v55, %v222_v49  ;;  %v282_v60 = vrot.slane %v281_v56, 2  ;;  %v232_v61 = vrot.slane %v231_v57, 2  ;;  %v290_v62 = vadd.f32 %v289_v58, %v288_v52 }
  0xf5   :  { %v225_v1 = vrot.slane %v224_v59, 1  ;;  %v283_v2 = vadd.f32 %v282_v60, %v281_v56  ;;  %v233_v3 = vadd.f32 %v232_v61, %v231_v57  ;;  %v291_v4 = vrot.slane %v290_v62, 2 }
  0xf7   :  { %v284_v5 = vrot.slane %v283_v2, 1  ;;  %v234_v6 = vrot.slane %v233_v3, 1  ;;  %v292_v7 = vadd.f32 %v291_v4, %v290_v62  ;;  %v226_v8 = vadd.f32 %v225_v1, %v224_v59 }
  0xf9   :  { %v235_v9 = vadd.f32 %v234_v6, %v233_v3  ;;  %v293_v11 = vrot.slane %v292_v7, 1  ;;  %v285_v12 = vadd.f32 %v284_v5, %v283_v2 }
  0xfb   :  { %v238_v13 = vcombine.low %v226_v8, %v235_v9  ;;  %v294_v14 = vadd.f32 %v293_v11, %v292_v7 }
  0xfd   :  { %v245_v15 = vrot.slane %v238_v13, %v244_v10  ;;  %v297_v16 = vcombine.low %v285_v12, %v294_v14 }
  0xff   :  { %v252_v18 = vrot.slane %v245_v15, %v244_v10  ;;  %v304_v20 = vrot.slane %v297_v16, %v244_v10 }
 0x101   :  { %v254_v22 = vadd.f32 %v252_v18, %v209_v17  ;;  %v311_v23 = vrot.slane %v304_v20, %v244_v10 }
 0x103   :  { %259 = vst.msk [vmem:[%s474_s2] sm:$0x3] %vm257_vm1, %v254_v22  ;;  %v313_v24 = vadd.f32 %v311_v23, %v260_v21 }
 0x105   :  { %314 = vst.msk [vmem:[%s474_s2 + $0x2] sm:$0x3] %vm257_vm1, %v313_v24 }

// kernel: basic_block_pallas.4
= control target key start
LH: loop header
LB: loop body
LE: loop exit
PB: predicated region body
PF: predicated region fallthrough
CT: control target
= control target key end

     0   :  { %v964_v1 = vmov 0   ;;  %v21_v41 = vlaneseq  ;;  %vm965_vm5 = vmmov 1   ;;  %s1193_s1 = inlined_call_operand.vmem [shape: bf16[128,256], index: 1, kind: input, shape index: {}]   ;;  %s1194_s0 = inlined_call_operand.vmem [shape: bf16[32,128], index: 0, kind: input, shape index: {}]   ;;  %s1195_s4 = inlined_call_operand.vmem [shape: bf16[3,128,128], index: 4, kind: input, shape index: {}]   ;;  %s1196_s2 = inlined_call_operand.vmem [shape: f32[1,128], index: 2, kind: input, shape index: {}]   ;;  %s1197_s3 = inlined_call_operand.vmem [shape: f32[1,128], index: 3, kind: input, shape index: {}]   ;;  %s1198_s5 = inlined_call_operand.vmem [shape: f32[1,256], index: 5, kind: output, shape index: {}]  }
   0x1   :  { %v914_v0 = vld [vmem:[%s1193_s1 + $0x74] ss:$8 sps:$4 sm:$0xff]   ;;  %226 = vmatprep.mubr.bf16.mxu0 %v964_v1  ;;  %v916_v2 = vld [vmem:[%s1193_s1 + $0x70] ss:$8 sps:$4 sm:$0xff]   ;;  %v917_v3 = vld [vmem:[%s1193_s1 + $0x64] ss:$8 sps:$4 sm:$0xff]  }
   0x2   :  { %194 = vmatprep.subr.bf16.mxu0 %v914_v0  ;;  %v919_v4 = vld [vmem:[%s1193_s1 + $0x60] ss:$8 sps:$4 sm:$0xff]   ;;  %v920_v5 = vld [vmem:[%s1193_s1 + $0x54] ss:$8 sps:$4 sm:$0xff]   ;;  %v922_v6 = vld [vmem:[%s1193_s1 + $0x50] ss:$8 sps:$4 sm:$0xff]  }
   0x3   :  { %195 = vmatpush1.bf16.msra.mxu0 %v916_v2  ;;  %v923_v7 = vld [vmem:[%s1193_s1 + $0x44] ss:$8 sps:$4 sm:$0xff]   ;;  %v925_v8 = vld [vmem:[%s1193_s1 + $0x40] ss:$8 sps:$4 sm:$0xff]   ;;  %v926_v9 = vld [vmem:[%s1193_s1 + $0x34] ss:$8 sps:$4 sm:$0xff]  }
   0x4   :  { %196 = vmatprep.subr.bf16.mxu0 %v917_v3  ;;  %v940_v10 = vld [vmem:[%s1195_s4 + $0x78] sm:$0xff]   ;;  %v941_v11 = vld [vmem:[%s1195_s4 + $0x70] sm:$0xff]   ;;  %v929_v13 = vld [vmem:[%s1193_s1 + $0x24] ss:$8 sps:$4 sm:$0xff]   ;;  %v1112_v46 = vshrl.u32 %v21_v41, 7  ;;  %vm686_vm11 = vcmp.lt.s32.totalorder %v21_v41, 256 }
   0x5   :  { %v928_v12 = vld [vmem:[%s1193_s1 + $0x30] ss:$8 sps:$4 sm:$0xff]   ;;  %851 = vmatprep.subr.bf16.mxu1 %v940_v10  ;;  %v931_v14 = vld [vmem:[%s1193_s1 + $0x20] ss:$8 sps:$4 sm:$0xff]   ;;  %v932_v16 = vld [vmem:[%s1193_s1 + $0x14] ss:$8 sps:$4 sm:$0xff]  }
   0x6   :  { %852 = vmatpush3.bf16.msra.mxu1 %v940_v10  ;;  %v943_v15 = vld [vmem:[%s1195_s4 + $0x68] sm:$0xff]   ;;  %v934_v17 = vld [vmem:[%s1193_s1 + $0x10] ss:$8 sps:$4 sm:$0xff]   ;;  %v938_v21 = vld [vmem:[%s1194_s0] sm:$0xff]   ;;  %v23_v49 = vadd.s32 8, %v1112_v46  ;;  %v24_v54 = vadd.s32 16, %v1112_v46 }
   0x7   :  { %197 = vmatpush1.bf16.msra.mxu0 %v919_v4  ;;  %853 = vmatprep.subr.bf16.mxu1 %v941_v11  ;;  %v935_v18 = vld [vmem:[%s1193_s1 + $0x4] ss:$8 sps:$4 sm:$0xff]   ;;  %v937_v19 = vld [vmem:[%s1193_s1] ss:$8 sps:$4 sm:$0xff]   ;;  %v942_v20 = vld [vmem:[%s1195_s4 + $0x38] sm:$0xff]   ;;  %v30_v62 = vand.u32 15, %v1112_v46 }
   0x8   :  { %198 = vmatprep.subr.bf16.mxu0 %v920_v5  ;;  %v944_v22 = vld [vmem:[%s1195_s4 + $0x30] sm:$0xff]   ;;  %v939_v23 = vld [vmem:[%s1194_s0 + $0x8] sm:$0xff]   ;;  %v945_v24 = vld [vmem:[%s1195_s4 + $0x60] sm:$0xff]   ;;  %v37_v58 = vand.u32 15, %v23_v49  ;;  %v44_v63 = vand.u32 15, %v24_v54  ;;  %vm296_vm0 = vcmp.lt.s32.totalorder %v1112_v46, 7 }
   0x9   :  { %v946_v25 = vld [vmem:[%s1195_s4 + $0x28] sm:$0xff]   ;;  %v947_v26 = vld [vmem:[%s1195_s4 + $0x58] sm:$0xff]   ;;  %v948_v27 = vld [vmem:[%s1195_s4 + $0x20] sm:$0xff]   ;;  %vm273_vm2 = vcmp.lt.s32.totalorder %v1112_v46, 1  ;;  %vm1129_vm3 = vcmp.ne.s32.totalorder %v30_v62, 0  ;;  %vm706_vm12 = vcmp.lt.s32.totalorder %v21_v41, 128 }
   0xa   :  { %854 = vmatpush3.bf16.msra.mxu1 %v941_v11  ;;  %v949_v28 = vld [vmem:[%s1195_s4 + $0x50] sm:$0xff]   ;;  %v950_v29 = vld [vmem:[%s1195_s4 + $0x18] sm:$0xff]   ;;  %v951_v30 = vld [vmem:[%s1195_s4 + $0x48] sm:$0xff]   ;;  %vm79_vm1 = vcmp.ne.s32.totalorder %v37_v58, 15  ;;  %vm1133_vm4 = vcmp.ne.s32.totalorder %v44_v63, 0 }
   0xb   :  { %199 = vmatpush1.bf16.msra.mxu0 %v922_v6  ;;  %855 = vmatprep.subr.bf16.mxu1 %v943_v15  ;;  %v952_v31 = vld [vmem:[%s1195_s4 + $0x10] sm:$0xff]   ;;  %v953_v32 = vld [vmem:[%s1195_s4 + $0x40] sm:$0xff]   ;;  %v954_v33 = vld [vmem:[%s1195_s4 + $0x8] sm:$0xff]  }
   0xc   :  { %200 = vmatprep.subr.bf16.mxu0 %v923_v7  ;;  %v1099_v34 = vld [vmem:[%s1195_s4 + $0xb8] sm:$0xff]   ;;  %v956_v35 = vld [vmem:[%s1195_s4] sm:$0xff]   ;;  %vm815_vm6 = vmpackc.low %vm79_vm1, %vm965_vm5 }
   0xd   :  { %v751_v36 = vld [vmem:[%s1196_s2] ss:$0 sm:$0xff]  ;;  %vm785_vm7 = vmpackc.low %vm965_vm5, %vm1129_vm3 }
   0xe   :  { %856 = vmatpush3.bf16.msra.mxu1 %v943_v15  ;;  %v752_v39 = vld [vmem:[%s1197_s3] ss:$0 sm:$0xff]  ;;  %vm788_vm8 = vmpackc.low %vm965_vm5, %vm1133_vm4 }
   0xf   :  { %201 = vmatpush1.bf16.msra.mxu0 %v925_v8  ;;  %857 = vmatprep.subr.bf16.mxu1 %v945_v24 }
  0x10   :  { %202 = vmatprep.subr.bf16.mxu0 %v926_v9 }
  0x12   :  { %858 = vmatpush3.bf16.msra.mxu1 %v945_v24  ;;  %v960_v24 = vld [vmem:[%s1195_s4 + $0x98] sm:$0xff]  }
  0x13   :  { %203 = vmatpush1.bf16.msra.mxu0 %v928_v12  ;;  %859 = vmatprep.subr.bf16.mxu1 %v947_v26 }
  0x14   :  { %204 = vmatprep.subr.bf16.mxu0 %v929_v13 }
  0x16   :  { %860 = vmatpush3.bf16.msra.mxu1 %v947_v26  ;;  %v962_v26 = vld [vmem:[%s1195_s4 + $0x88] sm:$0xff]  }
  0x17   :  { %205 = vmatpush1.bf16.msra.mxu0 %v931_v14  ;;  %861 = vmatprep.subr.bf16.mxu1 %v949_v28  ;;  %v957_v14 = vld [vmem:[%s1195_s4 + $0xb0] sm:$0xff]  }
  0x18   :  { %206 = vmatprep.subr.bf16.mxu0 %v932_v16 }
  0x1a   :  { %862 = vmatpush3.bf16.msra.mxu1 %v949_v28  ;;  %v963_v28 = vld [vmem:[%s1195_s4 + $0x80] sm:$0xff]  }
  0x1b   :  { %207 = vmatpush1.bf16.msra.mxu0 %v934_v17  ;;  %863 = vmatprep.subr.bf16.mxu1 %v951_v30 }
  0x1c   :  { %208 = vmatprep.subr.bf16.mxu0 %v935_v18 }
  0x1e   :  { %864 = vmatpush3.bf16.msra.mxu1 %v951_v30 }
  0x1f   :  { %209 = vmatpush1.bf16.msra.mxu0 %v937_v19  ;;  %865 = vmatprep.subr.bf16.mxu1 %v953_v32 }
  0x20   :  { %871 = vmatprep.subr.bf16.mxu0 %v942_v20 }
  0x22   :  { %227 = vmatmul.mubr.bf16.vlgmr.msra.gmra.mxu0 %v938_v21  ;;  %866 = vmatpush3.bf16.msra.mxu1 %v953_v32 }
  0x23   :  { %234 = vmatprep.mubr.bf16.mxu0 %v964_v1  ;;  %872 = vmatpush3.bf16.msra.mxu0 %v942_v20 }
  0x24   :  { %873 = vmatprep.subr.bf16.mxu0 %v944_v22  ;;  %891 = vmatprep.subr.bf16.mxu1 %v1099_v34 }
  0x27   :  { %874 = vmatpush3.bf16.msra.mxu0 %v944_v22  ;;  %v958_v22 = vld [vmem:[%s1195_s4 + $0xa8] sm:$0xff]  }
  0x28   :  { %875 = vmatprep.subr.bf16.mxu0 %v946_v25 }
  0x2a   :  { %235 = vmatmul.mubr.bf16.gmra.mxu0 %v939_v23  ;;  %v959_v23 = vld [vmem:[%s1195_s4 + $0xa0] sm:$0xff]  }
  0x2b   :  { %876 = vmatpush3.bf16.msra.mxu0 %v946_v25  ;;  %v961_v25 = vld [vmem:[%s1195_s4 + $0x90] sm:$0xff]  }
  0x2c   :  { %877 = vmatprep.subr.bf16.mxu0 %v948_v27 }
  0x2f   :  { %878 = vmatpush3.bf16.msra.mxu0 %v948_v27  ;;  %v25_v27 = vadd.s32 24, %v1112_v46 }
  0x30   :  { %879 = vmatprep.subr.bf16.mxu0 %v950_v29 }
  0x33   :  { %880 = vmatpush3.bf16.msra.mxu0 %v950_v29  ;;  %v51_v29 = vand.u32 15, %v25_v27 }
  0x34   :  { %881 = vmatprep.subr.bf16.mxu0 %v952_v31 }
  0x35   :  { %vm81_vm9 = vcmp.ne.s32.totalorder %v51_v29, 15 }
  0x36   :  { %vm818_vm10 = vmpackc.low %vm81_vm9, %vm965_vm5 }
  0x37   :  { %882 = vmatpush3.bf16.msra.mxu0 %v952_v31 }
  0x38   :  { %883 = vmatprep.subr.bf16.mxu0 %v954_v33 }
  0x3b   :  { %884 = vmatpush3.bf16.msra.mxu0 %v954_v33 }
  0x3c   :  { %885 = vmatprep.subr.bf16.mxu0 %v956_v35 }
  0x3f   :  { %886 = vmatpush3.bf16.msra.mxu0 %v956_v35 }
  0xe2   :  { %v228_v37 = vpop.f32.mrf.mxu0 }
  0xe3   :  { %v250_v38 = vmul.f32 %v751_v36, %v228_v37 }
  0xe4   :  { %v230_v40 = vpop.f32.mrf.mxu0 }
  0xe5   :  { %v261_v43 = vadd.f32 %v752_v39, %v250_v38 }
  0xe6   :  { %v231_v42 = vpop.f32.mrf.mxu0 }
  0xe7   :  { %v251_v44 = vmul.f32 %v751_v36, %v231_v42  ;;  %v1115_v50 = vmax.f32 %v261_v43, 0.0 }
  0xe8   :  { %v233_v45 = vpop.f32.mrf.mxu0 }
  0xe9   :  { %v262_v47 = vadd.f32 %v752_v39, %v251_v44  ;;  %v292_v3 = vrot.slane %v1115_v50, 1  ;;  %v269_v10 = vrot.slane %v1115_v50, 7 }
  0xea   :  { %v236_v48 = vpop.f32.mrf.mxu0 }
  0xeb   :  { %v266_v51 = vmax.f32 %v262_v47, 0.0  ;;  %v252_v52 = vmul.f32 %v751_v36, %v236_v48 }
  0xec   :  { %v238_v53 = vpop.f32.mrf.mxu0 }
  0xed   :  { %v263_v55 = vadd.f32 %v752_v39, %v252_v52  ;;  %v315_v56 = vpack.c.bf16 %v266_v51, %v1115_v50  ;;  %v293_v0 = vrot.slane %v266_v51, 1  ;;  %v270_v4 = vrot.slane %v266_v51, 7 }
  0xee   :  { %v239_v57 = vpop.f32.mrf.mxu0 }
  0xef   :  { %v1119_v59 = vmax.f32 %v263_v55, 0.0  ;;  %v253_v60 = vmul.f32 %v751_v36, %v239_v57  ;;  %867 = vmatprep.mubr.bf16.mxu1 %v315_v56  ;;  %v299_v13 = vsel %vm296_vm0, %v292_v3, %v293_v0  ;;  %v276_v18 = vsel %vm273_vm2, %v269_v10, %v270_v4 }
  0xf0   :  { %v241_v61 = vpop.f32.mrf.mxu0 }
  0xf1   :  { %v294_v1 = vrot.slane %v1119_v59, 1  ;;  %v264_v2 = vadd.f32 %v752_v39, %v253_v60  ;;  %v271_v5 = vrot.slane %v1119_v59, 7 }
  0xf3   :  { %v268_v6 = vmax.f32 %v264_v2, 0.0  ;;  %v298_v7 = vsel %vm296_vm0, %v293_v0, %v294_v1  ;;  %v275_v16 = vsel %vm273_vm2, %v270_v4, %v271_v5 }
  0xf4   :  { %v816_v15 = vpack.c.bf16 %v298_v7, %v299_v13 }
  0xf5   :  { %v272_v11 = vrot.slane %v268_v6, 7  ;;  %v316_v12 = vpack.c.bf16 %v268_v6, %v1119_v59  ;;  %v295_v30 = vrot.slane %v268_v6, 1 }
  0xf7   :  { %v274_v17 = vsel %vm273_vm2, %v271_v5, %v272_v11  ;;  %868 = vmatmul.mubr.bf16.vlgmr.msra.gmra.mxu1 %v316_v12  ;;  %v277_v19 = vsel %vm273_vm2, %v272_v11, %v269_v10  ;;  %v297_v31 = vsel %vm296_vm0, %v294_v1, %v295_v30  ;;  %v300_v32 = vsel %vm296_vm0, %v295_v30, %v292_v3 }
  0xf8   :  { %v789_v20 = vpack.c.bf16 %v274_v17, %v275_v16  ;;  %892 = vmatpush3.bf16.msra.mxu1 %v1099_v34  ;;  %907 = vmatprep.mubr.msk.bf16.mxu1 %vm815_vm6, %v816_v15  ;;  %v786_v21 = vpack.c.bf16 %v276_v18, %v277_v19  ;;  %v819_v33 = vpack.c.bf16 %v300_v32, %v297_v31  ;;  %v966_v34 = vmov 0.0  }
  0xf9   :  { %893 = vmatprep.subr.bf16.mxu1 %v957_v14  ;;  %688 = vst.msk [vmem:[%s1198_s5] sm:$0x3] %vm686_vm11, %v966_v34 }
  0xfa   :  { %887 = vmatprep.mubr.msk.bf16.mxu0 %vm785_vm7, %v786_v21 }
  0xfb   :  { %888 = vmatmul.mubr.msk.bf16.vlgmr.msra.gmra.mxu0 %vm788_vm8, %v789_v20 }
  0xfc   :  { %894 = vmatpush3.bf16.msra.mxu1 %v957_v14 }
  0xfd   :  { %895 = vmatprep.subr.bf16.mxu1 %v958_v22 }
 0x100   :  { %896 = vmatpush3.bf16.msra.mxu1 %v958_v22  ;;  %v689_v11 = vld [vmem:[%s1198_s5] sm:$0x1]  ;;  %v709_v14 = vld [vmem:[%s1198_s5 + $0x1] sm:$0x1] }
 0x101   :  { %897 = vmatprep.subr.bf16.mxu1 %v959_v23 }
 0x104   :  { %898 = vmatpush3.bf16.msra.mxu1 %v959_v23 }
 0x105   :  { %899 = vmatprep.subr.bf16.mxu1 %v960_v24 }
 0x108   :  { %900 = vmatpush3.bf16.msra.mxu1 %v960_v24 }
 0x109   :  { %901 = vmatprep.subr.bf16.mxu1 %v961_v25 }
 0x10c   :  { %902 = vmatpush3.bf16.msra.mxu1 %v961_v25 }
 0x10d   :  { %903 = vmatprep.subr.bf16.mxu1 %v962_v26 }
 0x110   :  { %904 = vmatpush3.bf16.msra.mxu1 %v962_v26 }
 0x111   :  { %905 = vmatprep.subr.bf16.mxu1 %v963_v28 }
 0x114   :  { %906 = vmatpush3.bf16.msra.mxu1 %v963_v28 }
 0x117   :  { %908 = vmatmul.mubr.msk.bf16.vlgmr.msra.gmra.mxu1 %vm818_vm10, %v819_v33 }
 0x1b7   :  { %v869_v35 = vpop.f32.mrf.mxu1 }
 0x1b9   :  { %v432_v36 = vpop.f32.mrf.mxu1 }
 0x1bb   :  { %v889_v37 = vpop.f32.mrf.mxu0  ;;  %v870_v38 = vpop.f32.mrf.mxu1 }
 0x1bc   :  { %v538_v48 = vadd.f32 %v889_v37, %v869_v35 }
 0x1bd   :  { %v529_v39 = vpop.f32.mrf.mxu0  ;;  %v435_v40 = vpop.f32.mrf.mxu1 }
 0x1be   :  { %v530_v46 = vadd.f32 %v529_v39, %v432_v36 }
 0x1bf   :  { %v890_v42 = vpop.f32.mrf.mxu0 }
 0x1c0   :  { %v541_v52 = vadd.f32 %v890_v42, %v870_v38 }
 0x1c1   :  { %v532_v44 = vpop.f32.mrf.mxu0 }
 0x1c2   :  { %v533_v49 = vadd.f32 %v532_v44, %v435_v40 }
 0x1d7   :  { %v909_v43 = vpop.f32.mrf.mxu1 }
 0x1d8   :  { %v660_v53 = vadd.f32 %v909_v43, %v538_v48 }
 0x1d9   :  { %v643_v45 = vpop.f32.mrf.mxu1 }
 0x1da   :  { %v658_v50 = vadd.f32 %v643_v45, %v530_v46  ;;  %v712_v59 = vmul.f32 %v660_v53, %v660_v53 }
 0x1db   :  { %v910_v47 = vpop.f32.mrf.mxu1 }
 0x1dc   :  { %v710_v55 = vmul.f32 %v658_v50, %v658_v50  ;;  %v661_v56 = vadd.f32 %v910_v47, %v541_v52 }
 0x1dd   :  { %v646_v51 = vpop.f32.mrf.mxu1 }
 0x1de   :  { %v659_v54 = vadd.f32 %v646_v51, %v533_v49  ;;  %v713_v62 = vmul.f32 %v661_v56, %v661_v56 }
 0x1e0   :  { %v694_v57 = vadd.f32 %v659_v54, %v658_v50  ;;  %v711_v58 = vmul.f32 %v659_v54, %v659_v54 }
 0x1e2   :  { %v695_v60 = vadd.f32 %v694_v57, %v660_v53  ;;  %v718_v61 = vadd.f32 %v711_v58, %v710_v55 }
 0x1e4   :  { %v696_v63 = vadd.f32 %v695_v60, %v661_v56  ;;  %v719_v0 = vadd.f32 %v718_v61, %v712_v59 }
 0x1e6   :  { %v697_v1 = vrot.slane %v696_v63, 4  ;;  %v720_v2 = vadd.f32 %v719_v0, %v713_v62 }
 0x1e8   :  { %v698_v3 = vadd.f32 %v697_v1, %v696_v63  ;;  %v721_v4 = vrot.slane %v720_v2, 4 }
 0x1ea   :  { %v699_v5 = vrot.slane %v698_v3, 2  ;;  %v722_v6 = vadd.f32 %v721_v4, %v720_v2 }
 0x1ec   :  { %v700_v7 = vadd.f32 %v699_v5, %v698_v3  ;;  %v723_v8 = vrot.slane %v722_v6, 2 }
 0x1ee   :  { %v701_v9 = vrot.slane %v700_v7, 1  ;;  %v724_v10 = vadd.f32 %v723_v8, %v722_v6 }
 0x1f0   :  { %v702_v12 = vadd.f32 %v701_v9, %v700_v7  ;;  %v725_v13 = vrot.slane %v724_v10, 1 }
 0x1f2   :  { %v703_v15 = vadd.f32 %v702_v12, %v689_v11  ;;  %v726_v16 = vadd.f32 %v725_v13, %v724_v10 }
 0x1f4   :  { %708 = vst.msk [vmem:[%s1198_s5] sm:$0x1] %vm706_vm12, %v703_v15  ;;  %v727_v17 = vadd.f32 %v726_v16, %v709_v14 }
 0x1f6   :  { %728 = vst.msk [vmem:[%s1198_s5 + $0x1] sm:$0x1] %vm706_vm12, %v727_v17 }

// kernel: basic_block_pallas.5
= control target key start
LH: loop header
LB: loop body
LE: loop exit
PB: predicated region body
PF: predicated region fallthrough
CT: control target
= control target key end

     0   :  { %v1007_v1 = vmov 0   ;;  %v33_v40 = vlaneseq  ;;  %vm1008_vm5 = vmmov 1   ;;  %s1264_s1 = inlined_call_operand.vmem [shape: bf16[128,256], index: 1, kind: input, shape index: {}]   ;;  %s1265_s0 = inlined_call_operand.vmem [shape: bf16[32,128], index: 0, kind: input, shape index: {}]   ;;  %s1266_s4 = inlined_call_operand.vmem [shape: bf16[3,128,128], index: 4, kind: input, shape index: {}]   ;;  %s1267_s2 = inlined_call_operand.vmem [shape: f32[1,128], index: 2, kind: input, shape index: {}]   ;;  %s1268_s3 = inlined_call_operand.vmem [shape: f32[1,128], index: 3, kind: input, shape index: {}]   ;;  %s1269_s5 = inlined_call_operand.vmem [shape: f32[1,128], index: 5, kind: input, shape index: {}]   ;;  %s1270_s7 = inlined_call_operand.vmem [shape: f32[1,128], index: 7, kind: input, shape index: {}]   ;;  %s1271_s6 = inlined_call_operand.vmem [shape: f32[1,128], index: 6, kind: input, shape index: {}]   ;;  %s1272_s8 = inlined_call_operand.vmem [shape: f32[1,128], index: 8, kind: input, shape index: {}]   ;;  %s1273_s9 = inlined_call_operand.vmem [shape: bf16[32,128], index: 9, kind: output, shape index: {}]  }
   0x1   :  { %v957_v0 = vld [vmem:[%s1264_s1 + $0x74] ss:$8 sps:$4 sm:$0xff]   ;;  %238 = vmatprep.mubr.bf16.mxu0 %v1007_v1  ;;  %v959_v2 = vld [vmem:[%s1264_s1 + $0x70] ss:$8 sps:$4 sm:$0xff]   ;;  %v960_v3 = vld [vmem:[%s1264_s1 + $0x64] ss:$8 sps:$4 sm:$0xff]  }
   0x2   :  { %206 = vmatprep.subr.bf16.mxu0 %v957_v0  ;;  %v962_v4 = vld [vmem:[%s1264_s1 + $0x60] ss:$8 sps:$4 sm:$0xff]   ;;  %v963_v5 = vld [vmem:[%s1264_s1 + $0x54] ss:$8 sps:$4 sm:$0xff]   ;;  %v965_v6 = vld [vmem:[%s1264_s1 + $0x50] ss:$8 sps:$4 sm:$0xff]  }
   0x3   :  { %207 = vmatpush1.bf16.msra.mxu0 %v959_v2  ;;  %v966_v7 = vld [vmem:[%s1264_s1 + $0x44] ss:$8 sps:$4 sm:$0xff]   ;;  %v968_v8 = vld [vmem:[%s1264_s1 + $0x40] ss:$8 sps:$4 sm:$0xff]   ;;  %v969_v9 = vld [vmem:[%s1264_s1 + $0x34] ss:$8 sps:$4 sm:$0xff]  }
   0x4   :  { %208 = vmatprep.subr.bf16.mxu0 %v960_v3  ;;  %v983_v10 = vld [vmem:[%s1266_s4 + $0x78] sm:$0xff]   ;;  %v984_v11 = vld [vmem:[%s1266_s4 + $0x70] sm:$0xff]   ;;  %v972_v13 = vld [vmem:[%s1264_s1 + $0x24] ss:$8 sps:$4 sm:$0xff]   ;;  %v1177_v46 = vshrl.u32 %v33_v40, 7 }
   0x5   :  { %v971_v12 = vld [vmem:[%s1264_s1 + $0x30] ss:$8 sps:$4 sm:$0xff]   ;;  %895 = vmatprep.subr.bf16.mxu1 %v983_v10  ;;  %v974_v14 = vld [vmem:[%s1264_s1 + $0x20] ss:$8 sps:$4 sm:$0xff]   ;;  %v975_v16 = vld [vmem:[%s1264_s1 + $0x14] ss:$8 sps:$4 sm:$0xff]  }
   0x6   :  { %896 = vmatpush3.bf16.msra.mxu1 %v983_v10  ;;  %v986_v15 = vld [vmem:[%s1266_s4 + $0x68] sm:$0xff]   ;;  %v977_v17 = vld [vmem:[%s1264_s1 + $0x10] ss:$8 sps:$4 sm:$0xff]   ;;  %v981_v21 = vld [vmem:[%s1265_s0] sm:$0xff]   ;;  %v35_v49 = vadd.s32 8, %v1177_v46  ;;  %v36_v54 = vadd.s32 16, %v1177_v46 }
   0x7   :  { %209 = vmatpush1.bf16.msra.mxu0 %v962_v4  ;;  %897 = vmatprep.subr.bf16.mxu1 %v984_v11  ;;  %v978_v18 = vld [vmem:[%s1264_s1 + $0x4] ss:$8 sps:$4 sm:$0xff]   ;;  %v980_v19 = vld [vmem:[%s1264_s1] ss:$8 sps:$4 sm:$0xff]   ;;  %v985_v20 = vld [vmem:[%s1266_s4 + $0x38] sm:$0xff]   ;;  %v42_v61 = vand.u32 15, %v1177_v46 }
   0x8   :  { %210 = vmatprep.subr.bf16.mxu0 %v963_v5  ;;  %v987_v22 = vld [vmem:[%s1266_s4 + $0x30] sm:$0xff]   ;;  %v982_v23 = vld [vmem:[%s1265_s0 + $0x8] sm:$0xff]   ;;  %v988_v24 = vld [vmem:[%s1266_s4 + $0x60] sm:$0xff]   ;;  %v49_v58 = vand.u32 15, %v35_v49  ;;  %v56_v62 = vand.u32 15, %v36_v54  ;;  %vm312_vm0 = vcmp.lt.s32.totalorder %v1177_v46, 7 }
   0x9   :  { %v989_v25 = vld [vmem:[%s1266_s4 + $0x28] sm:$0xff]   ;;  %v990_v26 = vld [vmem:[%s1266_s4 + $0x58] sm:$0xff]   ;;  %v991_v27 = vld [vmem:[%s1266_s4 + $0x20] sm:$0xff]   ;;  %vm289_vm2 = vcmp.lt.s32.totalorder %v1177_v46, 1  ;;  %vm1196_vm3 = vcmp.ne.s32.totalorder %v42_v61, 0 }
   0xa   :  { %898 = vmatpush3.bf16.msra.mxu1 %v984_v11  ;;  %v992_v28 = vld [vmem:[%s1266_s4 + $0x50] sm:$0xff]   ;;  %v993_v29 = vld [vmem:[%s1266_s4 + $0x18] sm:$0xff]   ;;  %v994_v30 = vld [vmem:[%s1266_s4 + $0x48] sm:$0xff]   ;;  %vm91_vm1 = vcmp.ne.s32.totalorder %v49_v58, 15  ;;  %vm1200_vm4 = vcmp.ne.s32.totalorder %v56_v62, 0 }
   0xb   :  { %211 = vmatpush1.bf16.msra.mxu0 %v965_v6  ;;  %899 = vmatprep.subr.bf16.mxu1 %v986_v15  ;;  %v995_v31 = vld [vmem:[%s1266_s4 + $0x10] sm:$0xff]   ;;  %v996_v32 = vld [vmem:[%s1266_s4 + $0x40] sm:$0xff]   ;;  %v997_v33 = vld [vmem:[%s1266_s4 + $0x8] sm:$0xff]  }
   0xc   :  { %212 = vmatprep.subr.bf16.mxu0 %v966_v7  ;;  %v1161_v34 = vld [vmem:[%s1266_s4 + $0xb8] sm:$0xff]   ;;  %v999_v35 = vld [vmem:[%s1266_s4] sm:$0xff]   ;;  %vm836_vm6 = vmpackc.low %vm91_vm1, %vm1008_vm5 }
   0xd   :  { %v772_v36 = vld [vmem:[%s1267_s2] ss:$0 sm:$0xff]  ;;  %vm806_vm7 = vmpackc.low %vm1008_vm5, %vm1196_vm3 }
   0xe   :  { %900 = vmatpush3.bf16.msra.mxu1 %v986_v15  ;;  %v773_v41 = vld [vmem:[%s1268_s3] ss:$0 sm:$0xff]  ;;  %vm809_vm8 = vmpackc.low %vm1008_vm5, %vm1200_vm4 }
   0xf   :  { %213 = vmatpush1.bf16.msra.mxu0 %v968_v8  ;;  %901 = vmatprep.subr.bf16.mxu1 %v988_v24 }
  0x10   :  { %214 = vmatprep.subr.bf16.mxu0 %v969_v9 }
  0x12   :  { %902 = vmatpush3.bf16.msra.mxu1 %v988_v24  ;;  %v1004_v24 = vld [vmem:[%s1266_s4 + $0x90] sm:$0xff]  }
  0x13   :  { %215 = vmatpush1.bf16.msra.mxu0 %v971_v12  ;;  %903 = vmatprep.subr.bf16.mxu1 %v990_v26 }
  0x14   :  { %216 = vmatprep.subr.bf16.mxu0 %v972_v13  ;;  %v1000_v13 = vld [vmem:[%s1266_s4 + $0xb0] sm:$0xff]  }
  0x16   :  { %904 = vmatpush3.bf16.msra.mxu1 %v990_v26  ;;  %v37_v26 = vadd.s32 24, %v1177_v46  ;;  %v842_v46 = vld [vmem:[%s1270_s7] ss:$0 sm:$0xff] }
  0x17   :  { %217 = vmatpush1.bf16.msra.mxu0 %v974_v14  ;;  %905 = vmatprep.subr.bf16.mxu1 %v992_v28 }
  0x18   :  { %218 = vmatprep.subr.bf16.mxu0 %v975_v16 }
  0x1a   :  { %906 = vmatpush3.bf16.msra.mxu1 %v992_v28  ;;  %v63_v28 = vand.u32 15, %v37_v26 }
  0x1b   :  { %219 = vmatpush1.bf16.msra.mxu0 %v977_v17  ;;  %907 = vmatprep.subr.bf16.mxu1 %v994_v30 }
  0x1c   :  { %220 = vmatprep.subr.bf16.mxu0 %v978_v18  ;;  %vm93_vm9 = vcmp.ne.s32.totalorder %v63_v28, 15 }
  0x1d   :  { %vm839_vm10 = vmpackc.low %vm93_vm9, %vm1008_vm5 }
  0x1e   :  { %908 = vmatpush3.bf16.msra.mxu1 %v994_v30 }
  0x1f   :  { %221 = vmatpush1.bf16.msra.mxu0 %v980_v19  ;;  %909 = vmatprep.subr.bf16.mxu1 %v996_v32 }
  0x20   :  { %915 = vmatprep.subr.bf16.mxu0 %v985_v20 }
  0x22   :  { %239 = vmatmul.mubr.bf16.vlgmr.msra.gmra.mxu0 %v981_v21  ;;  %910 = vmatpush3.bf16.msra.mxu1 %v996_v32  ;;  %v1001_v21 = vld [vmem:[%s1266_s4 + $0xa8] sm:$0xff]  }
  0x23   :  { %248 = vmatprep.mubr.bf16.mxu0 %v1007_v1  ;;  %916 = vmatpush3.bf16.msra.mxu0 %v985_v20 }
  0x24   :  { %917 = vmatprep.subr.bf16.mxu0 %v987_v22  ;;  %935 = vmatprep.subr.bf16.mxu1 %v1161_v34 }
  0x27   :  { %918 = vmatpush3.bf16.msra.mxu0 %v987_v22  ;;  %v1002_v22 = vld [vmem:[%s1266_s4 + $0xa0] sm:$0xff]  }
  0x28   :  { %919 = vmatprep.subr.bf16.mxu0 %v989_v25 }
  0x2a   :  { %249 = vmatmul.mubr.bf16.gmra.mxu0 %v982_v23  ;;  %v1003_v23 = vld [vmem:[%s1266_s4 + $0x98] sm:$0xff]  }
  0x2b   :  { %920 = vmatpush3.bf16.msra.mxu0 %v989_v25  ;;  %v1005_v25 = vld [vmem:[%s1266_s4 + $0x88] sm:$0xff]  }
  0x2c   :  { %921 = vmatprep.subr.bf16.mxu0 %v991_v27 }
  0x2f   :  { %922 = vmatpush3.bf16.msra.mxu0 %v991_v27  ;;  %v1006_v27 = vld [vmem:[%s1266_s4 + $0x80] sm:$0xff]  }
  0x30   :  { %923 = vmatprep.subr.bf16.mxu0 %v993_v29 }
  0x33   :  { %924 = vmatpush3.bf16.msra.mxu0 %v993_v29 }
  0x34   :  { %925 = vmatprep.subr.bf16.mxu0 %v995_v31 }
  0x37   :  { %926 = vmatpush3.bf16.msra.mxu0 %v995_v31 }
  0x38   :  { %927 = vmatprep.subr.bf16.mxu0 %v997_v33 }
  0x3b   :  { %928 = vmatpush3.bf16.msra.mxu0 %v997_v33 }
  0x3c   :  { %929 = vmatprep.subr.bf16.mxu0 %v999_v35 }
  0x3f   :  { %930 = vmatpush3.bf16.msra.mxu0 %v999_v35 }
  0xe2   :  { %v240_v37 = vpop.f32.mrf.mxu0 }
  0xe3   :  { %v266_v38 = vmul.f32 %v772_v36, %v240_v37 }
  0xe4   :  { %v1170_v39 = vpop.f32.mrf.mxu0 }
  0xe5   :  { %v277_v44 = vadd.f32 %v773_v41, %v266_v38 }
  0xe6   :  { %v244_v42 = vpop.f32.mrf.mxu0 }
  0xe7   :  { %v267_v43 = vmul.f32 %v772_v36, %v244_v42  ;;  %v1180_v52 = vmax.f32 %v277_v44, 0.0  ;;  %v844_v44 = vld [vmem:[%s1269_s5] ss:$0 sm:$0xff] }
  0xe8   :  { %v1175_v45 = vpop.f32.mrf.mxu0 }
  0xe9   :  { %v278_v47 = vadd.f32 %v773_v41, %v267_v43  ;;  %v308_v2 = vrot.slane %v1180_v52, 1  ;;  %v285_v9 = vrot.slane %v1180_v52, 7 }
  0xea   :  { %v250_v48 = vpop.f32.mrf.mxu0 }
  0xeb   :  { %v282_v50 = vmax.f32 %v278_v47, 0.0  ;;  %v268_v51 = vmul.f32 %v772_v36, %v250_v48 }
  0xec   :  { %v1182_v53 = vpop.f32.mrf.mxu0 }
  0xed   :  { %v279_v55 = vadd.f32 %v773_v41, %v268_v51  ;;  %v331_v57 = vpack.c.bf16 %v282_v50, %v1180_v52  ;;  %v309_v63 = vrot.slane %v282_v50, 1  ;;  %v286_v3 = vrot.slane %v282_v50, 7  ;;  %v845_v50 = vld [vmem:[%s1271_s6] ss:$0 sm:$0xff] }
  0xee   :  { %v254_v56 = vpop.f32.mrf.mxu0  ;;  %v687_v52 = vmul.f32 %v842_v46, %v1182_v53 }
  0xef   :  { %v1186_v59 = vmax.f32 %v279_v55, 0.0  ;;  %v269_v60 = vmul.f32 %v772_v36, %v254_v56  ;;  %911 = vmatprep.mubr.bf16.mxu1 %v331_v57  ;;  %v315_v12 = vsel %vm312_vm0, %v308_v2, %v309_v63  ;;  %v292_v17 = vsel %vm289_vm2, %v285_v9, %v286_v3 }
  0xf0   :  { %v685_v57 = vmul.f32 %v842_v46, %v1170_v39 }
  0xf1   :  { %v310_v0 = vrot.slane %v1186_v59, 1  ;;  %v280_v1 = vadd.f32 %v773_v41, %v269_v60  ;;  %v287_v4 = vrot.slane %v1186_v59, 7  ;;  %v843_v60 = vld [vmem:[%s1272_s8] ss:$0 sm:$0xff] }
  0xf3   :  { %v284_v5 = vmax.f32 %v280_v1, 0.0  ;;  %v314_v6 = vsel %vm312_vm0, %v309_v63, %v310_v0  ;;  %v291_v15 = vsel %vm289_vm2, %v286_v3, %v287_v4  ;;  %v686_v1 = vmul.f32 %v842_v46, %v1175_v45 }
  0xf4   :  { %v837_v14 = vpack.c.bf16 %v314_v6, %v315_v12  ;;  %v698_v3 = vadd.f32 %v843_v60, %v687_v52  ;;  %v696_v6 = vadd.f32 %v843_v60, %v685_v57 }
  0xf5   :  { %v288_v10 = vrot.slane %v284_v5, 7  ;;  %v332_v11 = vpack.c.bf16 %v284_v5, %v1186_v59  ;;  %v311_v29 = vrot.slane %v284_v5, 1 }
  0xf7   :  { %v290_v16 = vsel %vm289_vm2, %v287_v4, %v288_v10  ;;  %912 = vmatmul.mubr.bf16.vlgmr.msra.gmra.mxu1 %v332_v11  ;;  %v293_v18 = vsel %vm289_vm2, %v288_v10, %v285_v9  ;;  %v313_v30 = vsel %vm312_vm0, %v310_v0, %v311_v29  ;;  %v316_v31 = vsel %vm312_vm0, %v311_v29, %v308_v2 }
  0xf8   :  { %v810_v19 = vpack.c.bf16 %v290_v16, %v291_v15  ;;  %936 = vmatpush3.bf16.msra.mxu1 %v1161_v34  ;;  %951 = vmatprep.mubr.msk.bf16.mxu1 %vm836_vm6, %v837_v14  ;;  %v807_v20 = vpack.c.bf16 %v292_v17, %v293_v18  ;;  %v840_v32 = vpack.c.bf16 %v316_v31, %v313_v30  ;;  %v256_v34 = vpop.f32.mrf.mxu0 }
  0xf9   :  { %937 = vmatprep.subr.bf16.mxu1 %v1000_v13  ;;  %v688_v58 = vmul.f32 %v842_v46, %v256_v34  ;;  %v697_v10 = vadd.f32 %v843_v60, %v686_v1 }
  0xfa   :  { %931 = vmatprep.mubr.msk.bf16.mxu0 %vm806_vm7, %v807_v20 }
  0xfb   :  { %932 = vmatmul.mubr.msk.bf16.vlgmr.msra.gmra.mxu0 %vm809_vm8, %v810_v19  ;;  %v699_v7 = vadd.f32 %v843_v60, %v688_v58 }
  0xfc   :  { %938 = vmatpush3.bf16.msra.mxu1 %v1000_v13 }
  0xfd   :  { %939 = vmatprep.subr.bf16.mxu1 %v1001_v21 }
 0x100   :  { %940 = vmatpush3.bf16.msra.mxu1 %v1001_v21 }
 0x101   :  { %941 = vmatprep.subr.bf16.mxu1 %v1002_v22 }
 0x104   :  { %942 = vmatpush3.bf16.msra.mxu1 %v1002_v22 }
 0x105   :  { %943 = vmatprep.subr.bf16.mxu1 %v1003_v23 }
 0x108   :  { %944 = vmatpush3.bf16.msra.mxu1 %v1003_v23 }
 0x109   :  { %945 = vmatprep.subr.bf16.mxu1 %v1004_v24 }
 0x10c   :  { %946 = vmatpush3.bf16.msra.mxu1 %v1004_v24 }
 0x10d   :  { %947 = vmatprep.subr.bf16.mxu1 %v1005_v25 }
 0x110   :  { %948 = vmatpush3.bf16.msra.mxu1 %v1005_v25 }
 0x111   :  { %949 = vmatprep.subr.bf16.mxu1 %v1006_v27 }
 0x114   :  { %950 = vmatpush3.bf16.msra.mxu1 %v1006_v27 }
 0x117   :  { %952 = vmatmul.mubr.msk.bf16.vlgmr.msra.gmra.mxu1 %vm839_vm10, %v840_v32 }
 0x1b7   :  { %v913_v33 = vpop.f32.mrf.mxu1 }
 0x1b9   :  { %v448_v35 = vpop.f32.mrf.mxu1 }
 0x1bb   :  { %v933_v36 = vpop.f32.mrf.mxu0  ;;  %v914_v37 = vpop.f32.mrf.mxu1 }
 0x1bc   :  { %v554_v42 = vadd.f32 %v933_v36, %v913_v33 }
 0x1bd   :  { %v545_v38 = vpop.f32.mrf.mxu0  ;;  %v451_v40 = vpop.f32.mrf.mxu1 }
 0x1be   :  { %v546_v47 = vadd.f32 %v545_v38, %v448_v35 }
 0x1bf   :  { %v934_v41 = vpop.f32.mrf.mxu0 }
 0x1c0   :  { %v557_v54 = vadd.f32 %v934_v41, %v914_v37 }
 0x1c1   :  { %v548_v49 = vpop.f32.mrf.mxu0 }
 0x1c2   :  { %v549_v61 = vadd.f32 %v548_v49, %v451_v40 }
 0x1d7   :  { %v953_v43 = vpop.f32.mrf.mxu1 }
 0x1d8   :  { %v676_v48 = vadd.f32 %v953_v43, %v554_v42 }
 0x1d9   :  { %v659_v51 = vpop.f32.mrf.mxu1 }
 0x1da   :  { %v709_v55 = vmul.f32 %v844_v44, %v676_v48  ;;  %v674_v56 = vadd.f32 %v659_v51, %v546_v47 }
 0x1db   :  { %v954_v59 = vpop.f32.mrf.mxu1 }
 0x1dc   :  { %v720_v62 = vadd.f32 %v845_v50, %v709_v55  ;;  %v707_v63 = vmul.f32 %v844_v44, %v674_v56  ;;  %v677_v0 = vadd.f32 %v954_v59, %v557_v54 }
 0x1dd   :  { %v662_v2 = vpop.f32.mrf.mxu1 }
 0x1de   :  { %v718_v53 = vadd.f32 %v845_v50, %v707_v63  ;;  %v710_v4 = vmul.f32 %v844_v44, %v677_v0  ;;  %v675_v5 = vadd.f32 %v662_v2, %v549_v61  ;;  %v724_v39 = vadd.f32 %v720_v62, %v698_v3 }
 0x1e0   :  { %v721_v8 = vadd.f32 %v845_v50, %v710_v4  ;;  %v708_v9 = vmul.f32 %v844_v44, %v675_v5  ;;  %v722_v11 = vadd.f32 %v718_v53, %v696_v6  ;;  %v728_v14 = vmax.f32 %v724_v39, 0.0 }
 0x1e2   :  { %v725_v12 = vadd.f32 %v721_v8, %v699_v7  ;;  %v719_v13 = vadd.f32 %v845_v50, %v708_v9  ;;  %v726_v17 = vmax.f32 %v722_v11, 0.0 }
 0x1e4   :  { %v729_v15 = vmax.f32 %v725_v12, 0.0  ;;  %v723_v16 = vadd.f32 %v719_v13, %v697_v10 }
 0x1e6   :  { %v862_v18 = vpack.c.bf16 %v729_v15, %v728_v14  ;;  %v727_v45 = vmax.f32 %v723_v16, 0.0 }
 0x1e8   :  { %864 = vst [vmem:[%s1273_s9 + $0x8] sm:$0xff] %v862_v18   ;;  %v857_v19 = vpack.c.bf16 %v727_v45, %v726_v17 }
 0x1ea   :  { %858 = vst [vmem:[%s1273_s9] sm:$0xff] %v857_v19  }

</bundles_post_ra>
